<compile_context>
chip_gen: v7x
topology: tpu7x:2x2x1
jax: 0.10.0
libtpu: 0.0.40
codegen_flags: <defaults>
</compile_context>

<pallas_src>
import functools
import math

import jax
import jax.numpy as jnp
from jax.experimental import pallas as pl
from jax.experimental.pallas import tpu as pltpu


def _round_up(x: int, m: int) -> int:
    return (x + m - 1) // m * m


def _sigmoid(x):
    return 1.0 / (1.0 + jnp.exp(-x))


def _lstm_cell(gates, c_prev, H):
    """PyTorch LSTM cell from pre-activations (gate order i, f, g, o)."""
    i = _sigmoid(gates[:, 0 * H:1 * H])
    f = _sigmoid(gates[:, 1 * H:2 * H])
    g = jnp.tanh(gates[:, 2 * H:3 * H])
    o = _sigmoid(gates[:, 3 * H:4 * H])
    c = f * c_prev + i * g
    h = o * jnp.tanh(c)
    return h, c


def _unroll(T):
    return True if T <= 16 else 4


# ----------------------------------------------------------------------------
# Fused bi-LSTM layer kernel (full output sequence).
# refs = x_0..x_{n-1}, w_ih_0..w_ih_{n-1}, b, whh_fw, whh_bw,
#        out_fw, out_bw, gx_scratch
# ----------------------------------------------------------------------------
def _bilstm_seq_kernel(*refs, n_in):
    x_refs = refs[:n_in]
    w_refs = refs[n_in:2 * n_in]
    (b_ref, whh_fw_ref, whh_bw_ref,
     out_fw_ref, out_bw_ref, gx_ref) = refs[2 * n_in:]
    T, Bt, _ = x_refs[0].shape
    H = whh_fw_ref.shape[0]

    # phase 1: one big MXU matmul -> input projections of both directions,
    # all timesteps, accumulated over the (possibly split) input streams.
    gx = b_ref[...]
    for xr, wr in zip(x_refs, w_refs):
        D = xr.shape[-1]
        gx = gx + jnp.dot(xr[...].reshape(T * Bt, D), wr[...],
                          preferred_element_type=jnp.float32)
    gx_ref[...] = gx.reshape(T, Bt, 8 * H)

    # phase 2: interleaved forward / backward recurrences (sequential in T).
    def step(s, carry):
        h_fw, c_fw, h_bw, c_bw = carry
        t_bw = T - 1 - s
        g_fw = gx_ref[s][:, :4 * H] + jnp.dot(
            h_fw, whh_fw_ref[...], preferred_element_type=jnp.float32)
        g_bw = gx_ref[t_bw][:, 4 * H:] + jnp.dot(
            h_bw, whh_bw_ref[...], preferred_element_type=jnp.float32)
        h_fw, c_fw = _lstm_cell(g_fw, c_fw, H)
        h_bw, c_bw = _lstm_cell(g_bw, c_bw, H)
        out_fw_ref[s] = h_fw
        out_bw_ref[t_bw] = h_bw
        return (h_fw, c_fw, h_bw, c_bw)

    zero = jnp.zeros((Bt, H), jnp.float32)
    jax.lax.fori_loop(0, T, step, (zero, zero, zero, zero), unroll=_unroll(T))


# ----------------------------------------------------------------------------
# Fused bi-LSTM layer kernel, final states only (for encoder_lstm_2):
# outputs h_fw at t=T-1 and h_bw at t=0 (== the bottleneck halves).
# ----------------------------------------------------------------------------
def _bilstm_final_kernel(*refs, n_in):
    x_refs = refs[:n_in]
    w_refs = refs[n_in:2 * n_in]
    (b_ref, whh_fw_ref, whh_bw_ref,
     hlast_fw_ref, hfirst_bw_ref, gx_ref) = refs[2 * n_in:]
    T, Bt, _ = x_refs[0].shape
    H = whh_fw_ref.shape[0]

    gx = b_ref[...]
    for xr, wr in zip(x_refs, w_refs):
        D = xr.shape[-1]
        gx = gx + jnp.dot(xr[...].reshape(T * Bt, D), wr[...],
                          preferred_element_type=jnp.float32)
    gx_ref[...] = gx.reshape(T, Bt, 8 * H)

    def step(s, carry):
        h_fw, c_fw, h_bw, c_bw = carry
        t_bw = T - 1 - s
        g_fw = gx_ref[s][:, :4 * H] + jnp.dot(
            h_fw, whh_fw_ref[...], preferred_element_type=jnp.float32)
        g_bw = gx_ref[t_bw][:, 4 * H:] + jnp.dot(
            h_bw, whh_bw_ref[...], preferred_element_type=jnp.float32)
        h_fw, c_fw = _lstm_cell(g_fw, c_fw, H)
        h_bw, c_bw = _lstm_cell(g_bw, c_bw, H)
        return (h_fw, c_fw, h_bw, c_bw)

    zero = jnp.zeros((Bt, H), jnp.float32)
    h_fw, _, h_bw, _ = jax.lax.fori_loop(0, T, step, (zero, zero, zero, zero),
                                         unroll=_unroll(T))
    hlast_fw_ref[...] = h_fw       # forward output at t = T-1
    hfirst_bw_ref[...] = h_bw      # backward output at t = 0


# ----------------------------------------------------------------------------
# Fused bi-LSTM layer kernel with a TIME-CONSTANT input (first decoder layer):
# the input projection is computed once per row and reused every timestep.
# ----------------------------------------------------------------------------
def _bilstm_const_kernel(x_ref, w_ih_ref, b_ref, whh_fw_ref, whh_bw_ref,
                         out_fw_ref, out_bw_ref):
    Bt, _ = x_ref.shape
    T = out_fw_ref.shape[0]
    H = whh_fw_ref.shape[0]

    gx = jnp.dot(x_ref[...], w_ih_ref[...],
                 preferred_element_type=jnp.float32) + b_ref[...]
    gx_fw = gx[:, :4 * H]
    gx_bw = gx[:, 4 * H:]

    def step(s, carry):
        h_fw, c_fw, h_bw, c_bw = carry
        t_bw = T - 1 - s
        g_fw = gx_fw + jnp.dot(h_fw, whh_fw_ref[...],
                               preferred_element_type=jnp.float32)
        g_bw = gx_bw + jnp.dot(h_bw, whh_bw_ref[...],
                               preferred_element_type=jnp.float32)
        h_fw, c_fw = _lstm_cell(g_fw, c_fw, H)
        h_bw, c_bw = _lstm_cell(g_bw, c_bw, H)
        out_fw_ref[s] = h_fw
        out_bw_ref[t_bw] = h_bw
        return (h_fw, c_fw, h_bw, c_bw)

    zero = jnp.zeros((Bt, H), jnp.float32)
    jax.lax.fori_loop(0, T, step, (zero, zero, zero, zero), unroll=_unroll(T))


# ----------------------------------------------------------------------------
# Fused MLP head: y = tanh(h_fw @ W1[:H] + h_bw @ W1[H:] + b1) @ W2 + b2
# (fw/bw concat folded into the row-split of W1; output lane-padded to 128).
# ----------------------------------------------------------------------------
def _mlp_head_kernel(xf_ref, xb_ref, w1f_ref, w1b_ref, b1_ref, w2_ref, b2_ref,
                     o_ref):
    h = (jnp.dot(xf_ref[...], w1f_ref[...], preferred_element_type=jnp.float32)
         + jnp.dot(xb_ref[...], w1b_ref[...], preferred_element_type=jnp.float32)
         + b1_ref[...])
    h = jnp.tanh(h)
    y = jnp.dot(h, w2_ref[...], preferred_element_type=jnp.float32) + b2_ref[...]
    o_ref[...] = y.astype(o_ref.dtype)


# ----------------------------------------------------------------------------
# Wrappers
# ----------------------------------------------------------------------------
def _split_w_ih(w_ih, xs):
    if len(xs) == 1:
        return (w_ih,)
    d0 = xs[0].shape[-1]
    return (w_ih[:d0], w_ih[d0:])


def bilstm_layer_seq(xs, w_parts, b, w_hh_fw, w_hh_bw, tile_b):
    """One fused bi-LSTM layer. xs: list of time-major (T, Bp, D_i) streams."""
    T, Bp, _ = xs[0].shape
    H = w_hh_fw.shape[0]
    n_in = len(xs)
    d_total = sum(int(x.shape[-1]) for x in xs)
    cost = pl.CostEstimate(
        flops=2 * T * Bp * d_total * 8 * H + 2 * T * Bp * H * 8 * H
              + 30 * T * Bp * H,
        transcendentals=8 * T * Bp * H,
        bytes_accessed=4 * (T * Bp * d_total + d_total * 8 * H + 8 * H * H
                            + 8 * H + 2 * T * Bp * H),
    )
    in_specs = (
        [pl.BlockSpec((T, tile_b, int(x.shape[-1])), lambda bi: (0, bi, 0))
         for x in xs]
        + [pl.BlockSpec((int(w.shape[0]), 8 * H), lambda bi: (0, 0))
           for w in w_parts]
        + [pl.BlockSpec((1, 8 * H), lambda bi: (0, 0)),
           pl.BlockSpec((H, 4 * H), lambda bi: (0, 0)),
           pl.BlockSpec((H, 4 * H), lambda bi: (0, 0))])
    out_spec = pl.BlockSpec((T, tile_b, H), lambda bi: (0, bi, 0))
    return pl.pallas_call(
        functools.partial(_bilstm_seq_kernel, n_in=n_in),
        out_shape=(jax.ShapeDtypeStruct((T, Bp, H), jnp.float32),
                   jax.ShapeDtypeStruct((T, Bp, H), jnp.float32)),
        grid=(Bp // tile_b,),
        in_specs=in_specs,
        out_specs=(out_spec, out_spec),
        scratch_shapes=[pltpu.VMEM((T, tile_b, 8 * H), jnp.float32)],
        compiler_params=pltpu.CompilerParams(
            dimension_semantics=("parallel",)),
        cost_estimate=cost,
    )(*xs, *w_parts, b, w_hh_fw, w_hh_bw)


def bilstm_layer_final(xs, w_parts, b, w_hh_fw, w_hh_bw, tile_b):
    """bi-LSTM layer that only returns (h_fw[T-1], h_bw[0]) — the bottleneck."""
    T, Bp, _ = xs[0].shape
    H = w_hh_fw.shape[0]
    n_in = len(xs)
    in_specs = (
        [pl.BlockSpec((T, tile_b, int(x.shape[-1])), lambda bi: (0, bi, 0))
         for x in xs]
        + [pl.BlockSpec((int(w.shape[0]), 8 * H), lambda bi: (0, 0))
           for w in w_parts]
        + [pl.BlockSpec((1, 8 * H), lambda bi: (0, 0)),
           pl.BlockSpec((H, 4 * H), lambda bi: (0, 0)),
           pl.BlockSpec((H, 4 * H), lambda bi: (0, 0))])
    out_spec = pl.BlockSpec((tile_b, H), lambda bi: (bi, 0))
    return pl.pallas_call(
        functools.partial(_bilstm_final_kernel, n_in=n_in),
        out_shape=(jax.ShapeDtypeStruct((Bp, H), jnp.float32),
                   jax.ShapeDtypeStruct((Bp, H), jnp.float32)),
        grid=(Bp // tile_b,),
        in_specs=in_specs,
        out_specs=(out_spec, out_spec),
        scratch_shapes=[pltpu.VMEM((T, tile_b, 8 * H), jnp.float32)],
        compiler_params=pltpu.CompilerParams(
            dimension_semantics=("parallel",)),
    )(*xs, *w_parts, b, w_hh_fw, w_hh_bw)


def bilstm_layer_const(x_const, seq_len, w_ih, b, w_hh_fw, w_hh_bw, tile_b):
    """bi-LSTM layer whose input is constant over time (repeated bottleneck)."""
    Bp, D = x_const.shape
    H = w_hh_fw.shape[0]
    in_specs = [pl.BlockSpec((tile_b, D), lambda bi: (bi, 0)),
                pl.BlockSpec((D, 8 * H), lambda bi: (0, 0)),
                pl.BlockSpec((1, 8 * H), lambda bi: (0, 0)),
                pl.BlockSpec((H, 4 * H), lambda bi: (0, 0)),
                pl.BlockSpec((H, 4 * H), lambda bi: (0, 0))]
    out_spec = pl.BlockSpec((seq_len, tile_b, H), lambda bi: (0, bi, 0))
    return pl.pallas_call(
        _bilstm_const_kernel,
        out_shape=(jax.ShapeDtypeStruct((seq_len, Bp, H), jnp.float32),
                   jax.ShapeDtypeStruct((seq_len, Bp, H), jnp.float32)),
        grid=(Bp // tile_b,),
        in_specs=in_specs,
        out_specs=(out_spec, out_spec),
        compiler_params=pltpu.CompilerParams(
            dimension_semantics=("parallel",)),
    )(x_const, w_ih, b, w_hh_fw, w_hh_bw)


def pallas_mlp_head(x_fw, x_bw, w1f, w1b, b1, w2, b2, out_dim, tile_n=512):
    N, H = x_fw.shape
    M1, M2 = w1f.shape[1], w2.shape[1]
    tile_n = min(tile_n, _round_up(N, 8))
    Np = _round_up(N, tile_n)
    if Np != N:
        padcfg = ((0, Np - N), (0, 0))
        x_fw = jnp.pad(x_fw, padcfg)
        x_bw = jnp.pad(x_bw, padcfg)
    cost = pl.CostEstimate(
        flops=2 * Np * (2 * H * M1 + M1 * M2),
        transcendentals=Np * M1,
        bytes_accessed=4 * (2 * Np * H + 2 * H * M1 + M1 * M2 + M1 + M2
                            + Np * M2),
    )
    out = pl.pallas_call(
        _mlp_head_kernel,
        out_shape=jax.ShapeDtypeStruct((Np, M2), jnp.float32),
        grid=(Np // tile_n,),
        in_specs=[pl.BlockSpec((tile_n, H), lambda i: (i, 0)),
                  pl.BlockSpec((tile_n, H), lambda i: (i, 0)),
                  pl.BlockSpec((H, M1), lambda i: (0, 0)),
                  pl.BlockSpec((H, M1), lambda i: (0, 0)),
                  pl.BlockSpec((1, M1), lambda i: (0, 0)),
                  pl.BlockSpec((M1, M2), lambda i: (0, 0)),
                  pl.BlockSpec((1, M2), lambda i: (0, 0))],
        out_specs=pl.BlockSpec((tile_n, M2), lambda i: (i, 0)),
        compiler_params=pltpu.CompilerParams(
            dimension_semantics=("parallel",)),
        cost_estimate=cost,
    )(x_fw, x_bw, w1f, w1b, b1, w2, b2)
    return out[:N, :out_dim]


# ----------------------------------------------------------------------------
# Full forward pass (mirrors Fixed_length_autoencoder.forward)
# ----------------------------------------------------------------------------
def fixed_length_autoencoder_forward(x, params, bottleneck_size):
    B, T, _ = x.shape
    hidden = params["dec"][0]["w_hh_fw"].shape[0]

    # batch tile: as wide as VMEM comfortably allows (keeps gx + in/out blocks
    # well under the 32 MiB default scoped limit, safe for v7x's 64 MiB VMEM).
    tile_b = min(_round_up(B, 8), 256)
    while tile_b > 8 and tile_b * T * hidden * 4 * 16 > (16 << 20):
        tile_b //= 2
    Bp = _round_up(B, tile_b)

    # time-major once; batch padded once and carried padded (row-independent).
    x_tm = jnp.swapaxes(x, 0, 1)                     # (T, B, D)
    if Bp != B:
        x_tm = jnp.pad(x_tm, ((0, 0), (0, Bp - B), (0, 0)))

    # ---- encoder_lstm_1 ----
    xs = [x_tm]
    for lp in params["enc1"]:
        xs = list(bilstm_layer_seq(xs, _split_w_ih(lp["w_ih"], xs), lp["b"],
                                   lp["w_hh_fw"], lp["w_hh_bw"], tile_b))

    # ---- encoder_lstm_2: only final fwd / first bwd states are needed ----
    lp = params["enc2"]
    bn_fw, bn_bw = bilstm_layer_final(xs, _split_w_ih(lp["w_ih"], xs), lp["b"],
                                      lp["w_hh_fw"], lp["w_hh_bw"], tile_b)
    bottleneck_p = jnp.concatenate([bn_fw, bn_bw], axis=1)   # (Bp, 2*bn), tiny

    # ---- decoder: first layer input is time-constant ----
    lp = params["dec"][0]
    xs = list(bilstm_layer_const(bottleneck_p, T, lp["w_ih"], lp["b"],
                                 lp["w_hh_fw"], lp["w_hh_bw"], tile_b))
    for lp in params["dec"][1:]:
        xs = list(bilstm_layer_seq(xs, _split_w_ih(lp["w_ih"], xs), lp["b"],
                                   lp["w_hh_fw"], lp["w_hh_bw"], tile_b))

    # ---- Linear -> tanh -> Linear head ----
    h_fw, h_bw = xs
    H = h_fw.shape[-1]
    y = pallas_mlp_head(h_fw.reshape(T * Bp, H), h_bw.reshape(T * Bp, H),
                        params["w_full1"][:H], params["w_full1"][H:],
                        params["b_full1"], params["w_full2"], params["b_full2"],
                        params["num_mels"])
    y = jnp.swapaxes(y.reshape(T, Bp, -1), 0, 1)[:B]          # (B, T, num_mels)
    return y, bottleneck_p[:B]


# ----------------------------------------------------------------------------
# Parameter init (synthetic weights, PyTorch-style U(-1/sqrt(H), 1/sqrt(H)))
# ----------------------------------------------------------------------------
def init_params(key, num_mels, hidden, bottleneck, encoder_num_layers,
                decoder_num_layers):
    keys = iter(jax.random.split(key, 128))

    def uni(shape, scale):
        return jax.random.uniform(next(keys), shape, jnp.float32, -scale, scale)

    def lstm_layer(d_in, h):
        s = 1.0 / math.sqrt(h)
        w_ih = jnp.concatenate([uni((d_in, 4 * h), s),
                                uni((d_in, 4 * h), s)], axis=1)   # [fw | bw]
        b = jnp.concatenate([uni((1, 4 * h), s) + uni((1, 4 * h), s),
                             uni((1, 4 * h), s) + uni((1, 4 * h), s)], axis=1)
        return {"w_ih": w_ih, "b": b,
                "w_hh_fw": uni((h, 4 * h), s),
                "w_hh_bw": uni((h, 4 * h), s)}

    enc1, d = [], num_mels
    for _ in range(encoder_num_layers - 1):
        enc1.append(lstm_layer(d, hidden))
        d = 2 * hidden
    enc2 = lstm_layer(d, bottleneck)
    dec, d = [], 2 * bottleneck
    for _ in range(decoder_num_layers):
        dec.append(lstm_layer(d, hidden))
        d = 2 * hidden

    # full1 (2*hidden -> 300), full2 (300 -> num_mels); pad 300 -> 384 lanes
    # and num_mels -> 128 lanes so the head stays lane-dense (zeros are inert).
    F1, F1P = 300, _round_up(300, 128)
    M2P = _round_up(num_mels, 128)
    s1, s2 = 1.0 / math.sqrt(2 * hidden), 1.0 / math.sqrt(F1)
    w1 = jnp.pad(uni((2 * hidden, F1), s1), ((0, 0), (0, F1P - F1)))
    b1 = jnp.pad(uni((1, F1), s1), ((0, 0), (0, F1P - F1)))
    w2 = jnp.pad(uni((F1, num_mels), s2), ((0, F1P - F1), (0, M2P - num_mels)))
    b2 = jnp.pad(uni((1, num_mels), s2), ((0, 0), (0, M2P - num_mels)))
    return {"enc1": enc1, "enc2": enc2, "dec": dec,
            "w_full1": w1, "b_full1": b1, "w_full2": w2, "b_full2": b2,
            "num_mels": num_mels}


# ----------------------------------------------------------------------------
# Pure-JAX reference (same parameters, f32 HIGHEST-precision matmuls)
# ----------------------------------------------------------------------------
def _mm(a, b):
    return jnp.dot(a, b, precision=jax.lax.Precision.HIGHEST)


def _ref_lstm_scan(gx, w_hh, reverse):
    B, T, G = gx.shape
    H = w_hh.shape[0]
    if reverse:
        gx = jnp.flip(gx, axis=1)

    def step(carry, g_t):
        h, c = carry
        gates = g_t + _mm(h, w_hh)
        i = _sigmoid(gates[:, 0 * H:1 * H])
        f = _sigmoid(gates[:, 1 * H:2 * H])
        g = jnp.tanh(gates[:, 2 * H:3 * H])
        o = _sigmoid(gates[:, 3 * H:4 * H])
        c = f * c + i * g
        h = o * jnp.tanh(c)
        return (h, c), h

    init = (jnp.zeros((B, H), jnp.float32), jnp.zeros((B, H), jnp.float32))
    _, hs = jax.lax.scan(step, init, jnp.swapaxes(gx, 0, 1))
    hs = jnp.swapaxes(hs, 0, 1)
    if reverse:
        hs = jnp.flip(hs, axis=1)
    return hs


def _ref_bilstm_layer(x, lp):
    B, T, D = x.shape
    H = lp["w_hh_fw"].shape[0]
    gx = (_mm(x.reshape(B * T, D), lp["w_ih"]) + lp["b"]).reshape(B, T, 8 * H)
    h_fw = _ref_lstm_scan(gx[..., :4 * H], lp["w_hh_fw"], reverse=False)
    h_bw = _ref_lstm_scan(gx[..., 4 * H:], lp["w_hh_bw"], reverse=True)
    return jnp.concatenate([h_fw, h_bw], axis=-1)


def reference_forward(x, params, bottleneck_size):
    B, T, _ = x.shape
    h = x
    for lp in params["enc1"]:
        h = _ref_bilstm_layer(h, lp)
    h = _ref_bilstm_layer(h, params["enc2"])
    bn = bottleneck_size
    bv = jnp.concatenate([h[:, -1, :bn], h[:, 0, bn:]], axis=1)
    d = jnp.broadcast_to(bv[:, None, :], (B, T, 2 * bn))
    for lp in params["dec"]:
        d = _ref_bilstm_layer(d, lp)
    y = jnp.tanh(_mm(d.reshape(B * T, -1), params["w_full1"]) + params["b_full1"])
    y = _mm(y, params["w_full2"]) + params["b_full2"]
    y = y.reshape(B, T, -1)[..., :params["num_mels"]]
    return y, bv


if __name__ == "__main__":
    key = jax.random.PRNGKey(0)
    k_in, k_par = jax.random.split(key)

    # config-equivalent hyperparameters (small test sizes)
    NUM_MELS = 31 + 1        # config.data.num_mels + 1
    HIDDEN = 32              # config.model.hidden_size
    BOTTLENECK = 16          # config.model.bottleneck_size
    ENC_LAYERS = 2           # config.model.encoder_num_layers
    DEC_LAYERS = 2           # config.model.decoder_num_layers
    B, T = 2, 8              # batch, sequence length (batch_first=True)
    # TODO(synk): dropout between LSTM layers is 0.0 / inference -> omitted.

    x = jax.random.normal(k_in, (B, T, NUM_MELS), jnp.float32)
    params = init_params(k_par, NUM_MELS, HIDDEN, BOTTLENECK,
                         ENC_LAYERS, DEC_LAYERS)

    y, bottleneck = fixed_length_autoencoder_forward(x, params, BOTTLENECK)
    y = jax.block_until_ready(y)
    bottleneck = jax.block_until_ready(bottleneck)

    y_ref, bottleneck_ref = reference_forward(x, params, BOTTLENECK)
    assert y.shape == (B, T, NUM_MELS)
    assert bottleneck.shape == (B, 2 * BOTTLENECK)
    assert jnp.allclose(y, y_ref, atol=2e-3, rtol=2e-3), "output mismatch"
    assert jnp.allclose(bottleneck, bottleneck_ref, atol=2e-3, rtol=2e-3), \
        "bottleneck mismatch"

    print("KERNEL_OK")
</pallas_src>

<mosaic_0001>
module attributes {stable_mosaic.version = 11 : i64} {
  func.func @_bilstm_seq_kernel(%arg0: i32, %arg1: memref<8x8x32xf32, #tpu.memory_space<vmem>>, %arg2: memref<32x256xf32, #tpu.memory_space<vmem>>, %arg3: memref<1x256xf32, #tpu.memory_space<vmem>>, %arg4: memref<32x128xf32, #tpu.memory_space<vmem>>, %arg5: memref<32x128xf32, #tpu.memory_space<vmem>>, %arg6: memref<8x8x32xf32, #tpu.memory_space<vmem>>, %arg7: memref<8x8x32xf32, #tpu.memory_space<vmem>>, %arg8: memref<8x8x256xf32, #tpu.memory_space<vmem>>) attributes {dimension_semantics = [#tpu.dimension_semantics<parallel>], iteration_bounds = array<i64: 1>, scalar_prefetch = 0 : i64, scratch_operands = 1 : i64, tpu.core_type = #tpu.core_type<tc>, window_params = [{transform_indices = @transform_0, window_bounds = array<i64: 8, 8, 32>}, {pipeline_mode = #tpu.pipeline_mode<synchronous>, transform_indices = @transform_1, window_bounds = array<i64: 32, 256>}, {pipeline_mode = #tpu.pipeline_mode<synchronous>, transform_indices = @transform_2, window_bounds = array<i64: 1, 256>}, {pipeline_mode = #tpu.pipeline_mode<synchronous>, transform_indices = @transform_3, window_bounds = array<i64: 32, 128>}, {pipeline_mode = #tpu.pipeline_mode<synchronous>, transform_indices = @transform_4, window_bounds = array<i64: 32, 128>}, {transform_indices = @transform_5, window_bounds = array<i64: 8, 8, 32>}, {transform_indices = @transform_6, window_bounds = array<i64: 8, 8, 32>}]} {
    %c0 = arith.constant 0 : index
    %c0_0 = arith.constant 0 : index
    %0 = vector.load %arg3[%c0, %c0_0] : memref<1x256xf32, #tpu.memory_space<vmem>>, vector<1x256xf32>
    %c0_1 = arith.constant 0 : index
    %c0_2 = arith.constant 0 : index
    %c0_3 = arith.constant 0 : index
    %1 = vector.load %arg1[%c0_1, %c0_2, %c0_3] : memref<8x8x32xf32, #tpu.memory_space<vmem>>, vector<8x8x32xf32>
    %2 = vector.shape_cast %1 : vector<8x8x32xf32> to vector<64x32xf32>
    %c0_4 = arith.constant 0 : index
    %c0_5 = arith.constant 0 : index
    %3 = vector.load %arg2[%c0_4, %c0_5] : memref<32x256xf32, #tpu.memory_space<vmem>>, vector<32x256xf32>
    %cst = arith.constant dense<0.000000e+00> : vector<64x256xf32>
    %4 = tpu.matmul %2, %3, %cst {dimension_numbers = #tpu.dot_dimension_numbers<[1], [0], [0], [1], [0, 0, 1, 1], [], []>} : vector<64x32xf32>, vector<32x256xf32>, vector<64x256xf32> -> vector<64x256xf32>
    %5 = vector.broadcast %0 : vector<1x256xf32> to vector<64x256xf32>
    %6 = arith.addf %5, %4 : vector<64x256xf32>
    %7 = vector.shape_cast %6 : vector<64x256xf32> to vector<8x8x256xf32>
    %c0_6 = arith.constant 0 : index
    %c0_7 = arith.constant 0 : index
    %c0_8 = arith.constant 0 : index
    %8 = vector.load %arg8[%c0_6, %c0_7, %c0_8] : memref<8x8x256xf32, #tpu.memory_space<vmem>>, vector<8x8x256xf32>
    tpu.vector_store %arg8[%c0_6, %c0_7, %c0_8], %7 {strides = array<i32>} : memref<8x8x256xf32, #tpu.memory_space<vmem>>, vector<8x8x256xf32>,
    %cst_9 = arith.constant 0.000000e+00 : f32
    %9 = vector.broadcast %cst_9 : f32 to vector<8x32xf32>
    %c0_i32 = arith.constant 0 : i32
    %c7_i32 = arith.constant 7 : i32
    %10 = arith.subi %c7_i32, %c0_i32 : i32
    %11 = arith.index_cast %c0_i32 : i32 to index
    %c0_10 = arith.constant 0 : index
    %c0_11 = arith.constant 0 : index
    %12 = vector.load %arg8[%11, %c0_10, %c0_11] : memref<8x8x256xf32, #tpu.memory_space<vmem>>, vector<1x8x256xf32>
    %13 = vector.shape_cast %12 : vector<1x8x256xf32> to vector<8x256xf32>
    %14 = vector.extract_strided_slice %13 {offsets = [0, 0], sizes = [8, 128], strides = [1, 1]} : vector<8x256xf32> to vector<8x128xf32>
    %c0_12 = arith.constant 0 : index
    %c0_13 = arith.constant 0 : index
    %15 = vector.load %arg4[%c0_12, %c0_13] : memref<32x128xf32, #tpu.memory_space<vmem>>, vector<32x128xf32>
    %cst_14 = arith.constant dense<0.000000e+00> : vector<8x128xf32>
    %16 = tpu.matmul %9, %15, %cst_14 {dimension_numbers = #tpu.dot_dimension_numbers<[1], [0], [0], [1], [0, 0, 1, 1], [], []>} : vector<8x32xf32>, vector<32x128xf32>, vector<8x128xf32> -> vector<8x128xf32>
    %17 = arith.addf %14, %16 : vector<8x128xf32>
    %18 = arith.index_cast %10 : i32 to index
    %c0_15 = arith.constant 0 : index
    %c0_16 = arith.constant 0 : index
    %19 = vector.load %arg8[%18, %c0_15, %c0_16] : memref<8x8x256xf32, #tpu.memory_space<vmem>>, vector<1x8x256xf32>
    %20 = vector.shape_cast %19 : vector<1x8x256xf32> to vector<8x256xf32>
    %21 = vector.extract_strided_slice %20 {offsets = [0, 128], sizes = [8, 128], strides = [1, 1]} : vector<8x256xf32> to vector<8x128xf32>
    %c0_17 = arith.constant 0 : index
    %c0_18 = arith.constant 0 : index
    %22 = vector.load %arg5[%c0_17, %c0_18] : memref<32x128xf32, #tpu.memory_space<vmem>>, vector<32x128xf32>
    %cst_19 = arith.constant dense<0.000000e+00> : vector<8x128xf32>
    %23 = tpu.matmul %9, %22, %cst_19 {dimension_numbers = #tpu.dot_dimension_numbers<[1], [0], [0], [1], [0, 0, 1, 1], [], []>} : vector<8x32xf32>, vector<32x128xf32>, vector<8x128xf32> -> vector<8x128xf32>
    %24 = arith.addf %21, %23 : vector<8x128xf32>
    %25 = vector.extract_strided_slice %17 {offsets = [0, 0], sizes = [8, 32], strides = [1, 1]} : vector<8x128xf32> to vector<8x32xf32>
    %cst_20 = arith.constant 0.000000e+00 : f32
    %26 = vector.broadcast %cst_20 : f32 to vector<8x32xf32>
    %27 = arith.subf %26, %25 : vector<8x32xf32>
    %28 = math.exp %27 : vector<8x32xf32>
    %cst_21 = arith.constant 1.000000e+00 : f32
    %29 = vector.broadcast %cst_21 : f32 to vector<8x32xf32>
    %30 = arith.addf %29, %28 : vector<8x32xf32>
    %cst_22 = arith.constant 1.000000e+00 : f32
    %31 = vector.broadcast %cst_22 : f32 to vector<8x32xf32>
    %32 = arith.divf %31, %30 : vector<8x32xf32>
    %33 = vector.extract_strided_slice %17 {offsets = [0, 32], sizes = [8, 32], strides = [1, 1]} : vector<8x128xf32> to vector<8x32xf32>
    %cst_23 = arith.constant 0.000000e+00 : f32
    %34 = vector.broadcast %cst_23 : f32 to vector<8x32xf32>
    %35 = arith.subf %34, %33 : vector<8x32xf32>
    %36 = math.exp %35 : vector<8x32xf32>
    %cst_24 = arith.constant 1.000000e+00 : f32
    %37 = vector.broadcast %cst_24 : f32 to vector<8x32xf32>
    %38 = arith.addf %37, %36 : vector<8x32xf32>
    %cst_25 = arith.constant 1.000000e+00 : f32
    %39 = vector.broadcast %cst_25 : f32 to vector<8x32xf32>
    %40 = arith.divf %39, %38 : vector<8x32xf32>
    %41 = vector.extract_strided_slice %17 {offsets = [0, 64], sizes = [8, 32], strides = [1, 1]} : vector<8x128xf32> to vector<8x32xf32>
    %42 = math.tanh %41 : vector<8x32xf32>
    %43 = vector.extract_strided_slice %17 {offsets = [0, 96], sizes = [8, 32], strides = [1, 1]} : vector<8x128xf32> to vector<8x32xf32>
    %cst_26 = arith.constant 0.000000e+00 : f32
    %44 = vector.broadcast %cst_26 : f32 to vector<8x32xf32>
    %45 = arith.subf %44, %43 : vector<8x32xf32>
    %46 = math.exp %45 : vector<8x32xf32>
    %cst_27 = arith.constant 1.000000e+00 : f32
    %47 = vector.broadcast %cst_27 : f32 to vector<8x32xf32>
    %48 = arith.addf %47, %46 : vector<8x32xf32>
    %cst_28 = arith.constant 1.000000e+00 : f32
    %49 = vector.broadcast %cst_28 : f32 to vector<8x32xf32>
    %50 = arith.divf %49, %48 : vector<8x32xf32>
    %51 = arith.mulf %40, %9 : vector<8x32xf32>
    %52 = arith.mulf %32, %42 : vector<8x32xf32>
    %53 = arith.addf %51, %52 : vector<8x32xf32>
    %54 = math.tanh %53 : vector<8x32xf32>
    %55 = arith.mulf %50, %54 : vector<8x32xf32>
    %56 = vector.extract_strided_slice %24 {offsets = [0, 0], sizes = [8, 32], strides = [1, 1]} : vector<8x128xf32> to vector<8x32xf32>
    %cst_29 = arith.constant 0.000000e+00 : f32
    %57 = vector.broadcast %cst_29 : f32 to vector<8x32xf32>
    %58 = arith.subf %57, %56 : vector<8x32xf32>
    %59 = math.exp %58 : vector<8x32xf32>
    %cst_30 = arith.constant 1.000000e+00 : f32
    %60 = vector.broadcast %cst_30 : f32 to vector<8x32xf32>
    %61 = arith.addf %60, %59 : vector<8x32xf32>
    %cst_31 = arith.constant 1.000000e+00 : f32
    %62 = vector.broadcast %cst_31 : f32 to vector<8x32xf32>
    %63 = arith.divf %62, %61 : vector<8x32xf32>
    %64 = vector.extract_strided_slice %24 {offsets = [0, 32], sizes = [8, 32], strides = [1, 1]} : vector<8x128xf32> to vector<8x32xf32>
    %cst_32 = arith.constant 0.000000e+00 : f32
    %65 = vector.broadcast %cst_32 : f32 to vector<8x32xf32>
    %66 = arith.subf %65, %64 : vector<8x32xf32>
    %67 = math.exp %66 : vector<8x32xf32>
    %cst_33 = arith.constant 1.000000e+00 : f32
    %68 = vector.broadcast %cst_33 : f32 to vector<8x32xf32>
    %69 = arith.addf %68, %67 : vector<8x32xf32>
    %cst_34 = arith.constant 1.000000e+00 : f32
    %70 = vector.broadcast %cst_34 : f32 to vector<8x32xf32>
    %71 = arith.divf %70, %69 : vector<8x32xf32>
    %72 = vector.extract_strided_slice %24 {offsets = [0, 64], sizes = [8, 32], strides = [1, 1]} : vector<8x128xf32> to vector<8x32xf32>
    %73 = math.tanh %72 : vector<8x32xf32>
    %74 = vector.extract_strided_slice %24 {offsets = [0, 96], sizes = [8, 32], strides = [1, 1]} : vector<8x128xf32> to vector<8x32xf32>
    %cst_35 = arith.constant 0.000000e+00 : f32
    %75 = vector.broadcast %cst_35 : f32 to vector<8x32xf32>
    %76 = arith.subf %75, %74 : vector<8x32xf32>
    %77 = math.exp %76 : vector<8x32xf32>
    %cst_36 = arith.constant 1.000000e+00 : f32
    %78 = vector.broadcast %cst_36 : f32 to vector<8x32xf32>
    %79 = arith.addf %78, %77 : vector<8x32xf32>
    %cst_37 = arith.constant 1.000000e+00 : f32
    %80 = vector.broadcast %cst_37 : f32 to vector<8x32xf32>
    %81 = arith.divf %80, %79 : vector<8x32xf32>
    %82 = arith.mulf %71, %9 : vector<8x32xf32>
    %83 = arith.mulf %63, %73 : vector<8x32xf32>
    %84 = arith.addf %82, %83 : vector<8x32xf32>
    %85 = math.tanh %84 : vector<8x32xf32>
    %86 = arith.mulf %81, %85 : vector<8x32xf32>
    %87 = arith.index_cast %c0_i32 : i32 to index
    %c0_38 = arith.constant 0 : index
    %c0_39 = arith.constant 0 : index
    %88 = vector.load %arg6[%87, %c0_38, %c0_39] : memref<8x8x32xf32, #tpu.memory_space<vmem>>, vector<1x8x32xf32>
    %89 = vector.shape_cast %88 : vector<1x8x32xf32> to vector<8x32xf32>
    %90 = vector.shape_cast %55 : vector<8x32xf32> to vector<1x8x32xf32>
    tpu.vector_store %arg6[%87, %c0_38, %c0_39], %90 {strides = array<i32>} : memref<8x8x32xf32, #tpu.memory_space<vmem>>, vector<1x8x32xf32>,
    %91 = arith.index_cast %10 : i32 to index
    %c0_40 = arith.constant 0 : index
    %c0_41 = arith.constant 0 : index
    %92 = vector.load %arg7[%91, %c0_40, %c0_41] : memref<8x8x32xf32, #tpu.memory_space<vmem>>, vector<1x8x32xf32>
    %93 = vector.shape_cast %92 : vector<1x8x32xf32> to vector<8x32xf32>
    %94 = vector.shape_cast %86 : vector<8x32xf32> to vector<1x8x32xf32>
    tpu.vector_store %arg7[%91, %c0_40, %c0_41], %94 {strides = array<i32>} : memref<8x8x32xf32, #tpu.memory_space<vmem>>, vector<1x8x32xf32>,
    %c1_i32 = arith.constant 1 : i32
    %c7_i32_42 = arith.constant 7 : i32
    %95 = arith.subi %c7_i32_42, %c1_i32 : i32
    %96 = arith.index_cast %c1_i32 : i32 to index
    %c0_43 = arith.constant 0 : index
    %c0_44 = arith.constant 0 : index
    %97 = vector.load %arg8[%96, %c0_43, %c0_44] : memref<8x8x256xf32, #tpu.memory_space<vmem>>, vector<1x8x256xf32>
    %98 = vector.shape_cast %97 : vector<1x8x256xf32> to vector<8x256xf32>
    %99 = vector.extract_strided_slice %98 {offsets = [0, 0], sizes = [8, 128], strides = [1, 1]} : vector<8x256xf32> to vector<8x128xf32>
    %c0_45 = arith.constant 0 : index
    %c0_46 = arith.constant 0 : index
    %100 = vector.load %arg4[%c0_45, %c0_46] : memref<32x128xf32, #tpu.memory_space<vmem>>, vector<32x128xf32>
    %cst_47 = arith.constant dense<0.000000e+00> : vector<8x128xf32>
    %101 = tpu.matmul %55, %100, %cst_47 {dimension_numbers = #tpu.dot_dimension_numbers<[1], [0], [0], [1], [0, 0, 1, 1], [], []>} : vector<8x32xf32>, vector<32x128xf32>, vector<8x128xf32> -> vector<8x128xf32>
    %102 = arith.addf %99, %101 : vector<8x128xf32>
    %103 = arith.index_cast %95 : i32 to index
    %c0_48 = arith.constant 0 : index
    %c0_49 = arith.constant 0 : index
    %104 = vector.load %arg8[%103, %c0_48, %c0_49] : memref<8x8x256xf32, #tpu.memory_space<vmem>>, vector<1x8x256xf32>
    %105 = vector.shape_cast %104 : vector<1x8x256xf32> to vector<8x256xf32>
    %106 = vector.extract_strided_slice %105 {offsets = [0, 128], sizes = [8, 128], strides = [1, 1]} : vector<8x256xf32> to vector<8x128xf32>
    %c0_50 = arith.constant 0 : index
    %c0_51 = arith.constant 0 : index
    %107 = vector.load %arg5[%c0_50, %c0_51] : memref<32x128xf32, #tpu.memory_space<vmem>>, vector<32x128xf32>
    %cst_52 = arith.constant dense<0.000000e+00> : vector<8x128xf32>
    %108 = tpu.matmul %86, %107, %cst_52 {dimension_numbers = #tpu.dot_dimension_numbers<[1], [0], [0], [1], [0, 0, 1, 1], [], []>} : vector<8x32xf32>, vector<32x128xf32>, vector<8x128xf32> -> vector<8x128xf32>
    %109 = arith.addf %106, %108 : vector<8x128xf32>
    %110 = vector.extract_strided_slice %102 {offsets = [0, 0], sizes = [8, 32], strides = [1, 1]} : vector<8x128xf32> to vector<8x32xf32>
    %cst_53 = arith.constant 0.000000e+00 : f32
    %111 = vector.broadcast %cst_53 : f32 to vector<8x32xf32>
    %112 = arith.subf %111, %110 : vector<8x32xf32>
    %113 = math.exp %112 : vector<8x32xf32>
    %cst_54 = arith.constant 1.000000e+00 : f32
    %114 = vector.broadcast %cst_54 : f32 to vector<8x32xf32>
    %115 = arith.addf %114, %113 : vector<8x32xf32>
    %cst_55 = arith.constant 1.000000e+00 : f32
    %116 = vector.broadcast %cst_55 : f32 to vector<8x32xf32>
    %117 = arith.divf %116, %115 : vector<8x32xf32>
    %118 = vector.extract_strided_slice %102 {offsets = [0, 32], sizes = [8, 32], strides = [1, 1]} : vector<8x128xf32> to vector<8x32xf32>
    %cst_56 = arith.constant 0.000000e+00 : f32
    %119 = vector.broadcast %cst_56 : f32 to vector<8x32xf32>
    %120 = arith.subf %119, %118 : vector<8x32xf32>
    %121 = math.exp %120 : vector<8x32xf32>
    %cst_57 = arith.constant 1.000000e+00 : f32
    %122 = vector.broadcast %cst_57 : f32 to vector<8x32xf32>
    %123 = arith.addf %122, %121 : vector<8x32xf32>
    %cst_58 = arith.constant 1.000000e+00 : f32
    %124 = vector.broadcast %cst_58 : f32 to vector<8x32xf32>
    %125 = arith.divf %124, %123 : vector<8x32xf32>
    %126 = vector.extract_strided_slice %102 {offsets = [0, 64], sizes = [8, 32], strides = [1, 1]} : vector<8x128xf32> to vector<8x32xf32>
    %127 = math.tanh %126 : vector<8x32xf32>
    %128 = vector.extract_strided_slice %102 {offsets = [0, 96], sizes = [8, 32], strides = [1, 1]} : vector<8x128xf32> to vector<8x32xf32>
    %cst_59 = arith.constant 0.000000e+00 : f32
    %129 = vector.broadcast %cst_59 : f32 to vector<8x32xf32>
    %130 = arith.subf %129, %128 : vector<8x32xf32>
    %131 = math.exp %130 : vector<8x32xf32>
    %cst_60 = arith.constant 1.000000e+00 : f32
    %132 = vector.broadcast %cst_60 : f32 to vector<8x32xf32>
    %133 = arith.addf %132, %131 : vector<8x32xf32>
    %cst_61 = arith.constant 1.000000e+00 : f32
    %134 = vector.broadcast %cst_61 : f32 to vector<8x32xf32>
    %135 = arith.divf %134, %133 : vector<8x32xf32>
    %136 = arith.mulf %125, %53 : vector<8x32xf32>
    %137 = arith.mulf %117, %127 : vector<8x32xf32>
    %138 = arith.addf %136, %137 : vector<8x32xf32>
    %139 = math.tanh %138 : vector<8x32xf32>
    %140 = arith.mulf %135, %139 : vector<8x32xf32>
    %141 = vector.extract_strided_slice %109 {offsets = [0, 0], sizes = [8, 32], strides = [1, 1]} : vector<8x128xf32> to vector<8x32xf32>
    %cst_62 = arith.constant 0.000000e+00 : f32
    %142 = vector.broadcast %cst_62 : f32 to vector<8x32xf32>
    %143 = arith.subf %142, %141 : vector<8x32xf32>
    %144 = math.exp %143 : vector<8x32xf32>
    %cst_63 = arith.constant 1.000000e+00 : f32
    %145 = vector.broadcast %cst_63 : f32 to vector<8x32xf32>
    %146 = arith.addf %145, %144 : vector<8x32xf32>
    %cst_64 = arith.constant 1.000000e+00 : f32
    %147 = vector.broadcast %cst_64 : f32 to vector<8x32xf32>
    %148 = arith.divf %147, %146 : vector<8x32xf32>
    %149 = vector.extract_strided_slice %109 {offsets = [0, 32], sizes = [8, 32], strides = [1, 1]} : vector<8x128xf32> to vector<8x32xf32>
    %cst_65 = arith.constant 0.000000e+00 : f32
    %150 = vector.broadcast %cst_65 : f32 to vector<8x32xf32>
    %151 = arith.subf %150, %149 : vector<8x32xf32>
    %152 = math.exp %151 : vector<8x32xf32>
    %cst_66 = arith.constant 1.000000e+00 : f32
    %153 = vector.broadcast %cst_66 : f32 to vector<8x32xf32>
    %154 = arith.addf %153, %152 : vector<8x32xf32>
    %cst_67 = arith.constant 1.000000e+00 : f32
    %155 = vector.broadcast %cst_67 : f32 to vector<8x32xf32>
    %156 = arith.divf %155, %154 : vector<8x32xf32>
    %157 = vector.extract_strided_slice %109 {offsets = [0, 64], sizes = [8, 32], strides = [1, 1]} : vector<8x128xf32> to vector<8x32xf32>
    %158 = math.tanh %157 : vector<8x32xf32>
    %159 = vector.extract_strided_slice %109 {offsets = [0, 96], sizes = [8, 32], strides = [1, 1]} : vector<8x128xf32> to vector<8x32xf32>
    %cst_68 = arith.constant 0.000000e+00 : f32
    %160 = vector.broadcast %cst_68 : f32 to vector<8x32xf32>
    %161 = arith.subf %160, %159 : vector<8x32xf32>
    %162 = math.exp %161 : vector<8x32xf32>
    %cst_69 = arith.constant 1.000000e+00 : f32
    %163 = vector.broadcast %cst_69 : f32 to vector<8x32xf32>
    %164 = arith.addf %163, %162 : vector<8x32xf32>
    %cst_70 = arith.constant 1.000000e+00 : f32
    %165 = vector.broadcast %cst_70 : f32 to vector<8x32xf32>
    %166 = arith.divf %165, %164 : vector<8x32xf32>
    %167 = arith.mulf %156, %84 : vector<8x32xf32>
    %168 = arith.mulf %148, %158 : vector<8x32xf32>
    %169 = arith.addf %167, %168 : vector<8x32xf32>
    %170 = math.tanh %169 : vector<8x32xf32>
    %171 = arith.mulf %166, %170 : vector<8x32xf32>
    %172 = arith.index_cast %c1_i32 : i32 to index
    %c0_71 = arith.constant 0 : index
    %c0_72 = arith.constant 0 : index
    %173 = vector.load %arg6[%172, %c0_71, %c0_72] : memref<8x8x32xf32, #tpu.memory_space<vmem>>, vector<1x8x32xf32>
    %174 = vector.shape_cast %173 : vector<1x8x32xf32> to vector<8x32xf32>
    %175 = vector.shape_cast %140 : vector<8x32xf32> to vector<1x8x32xf32>
    tpu.vector_store %arg6[%172, %c0_71, %c0_72], %175 {strides = array<i32>} : memref<8x8x32xf32, #tpu.memory_space<vmem>>, vector<1x8x32xf32>,
    %176 = arith.index_cast %95 : i32 to index
    %c0_73 = arith.constant 0 : index
    %c0_74 = arith.constant 0 : index
    %177 = vector.load %arg7[%176, %c0_73, %c0_74] : memref<8x8x32xf32, #tpu.memory_space<vmem>>, vector<1x8x32xf32>
    %178 = vector.shape_cast %177 : vector<1x8x32xf32> to vector<8x32xf32>
    %179 = vector.shape_cast %171 : vector<8x32xf32> to vector<1x8x32xf32>
    tpu.vector_store %arg7[%176, %c0_73, %c0_74], %179 {strides = array<i32>} : memref<8x8x32xf32, #tpu.memory_space<vmem>>, vector<1x8x32xf32>,
    %c2_i32 = arith.constant 2 : i32
    %c7_i32_75 = arith.constant 7 : i32
    %180 = arith.subi %c7_i32_75, %c2_i32 : i32
    %181 = arith.index_cast %c2_i32 : i32 to index
    %c0_76 = arith.constant 0 : index
    %c0_77 = arith.constant 0 : index
    %182 = vector.load %arg8[%181, %c0_76, %c0_77] : memref<8x8x256xf32, #tpu.memory_space<vmem>>, vector<1x8x256xf32>
    %183 = vector.shape_cast %182 : vector<1x8x256xf32> to vector<8x256xf32>
    %184 = vector.extract_strided_slice %183 {offsets = [0, 0], sizes = [8, 128], strides = [1, 1]} : vector<8x256xf32> to vector<8x128xf32>
    %c0_78 = arith.constant 0 : index
    %c0_79 = arith.constant 0 : index
    %185 = vector.load %arg4[%c0_78, %c0_79] : memref<32x128xf32, #tpu.memory_space<vmem>>, vector<32x128xf32>
    %cst_80 = arith.constant dense<0.000000e+00> : vector<8x128xf32>
    %186 = tpu.matmul %140, %185, %cst_80 {dimension_numbers = #tpu.dot_dimension_numbers<[1], [0], [0], [1], [0, 0, 1, 1], [], []>} : vector<8x32xf32>, vector<32x128xf32>, vector<8x128xf32> -> vector<8x128xf32>
    %187 = arith.addf %184, %186 : vector<8x128xf32>
    %188 = arith.index_cast %180 : i32 to index
    %c0_81 = arith.constant 0 : index
    %c0_82 = arith.constant 0 : index
    %189 = vector.load %arg8[%188, %c0_81, %c0_82] : memref<8x8x256xf32, #tpu.memory_space<vmem>>, vector<1x8x256xf32>
    %190 = vector.shape_cast %189 : vector<1x8x256xf32> to vector<8x256xf32>
    %191 = vector.extract_strided_slice %190 {offsets = [0, 128], sizes = [8, 128], strides = [1, 1]} : vector<8x256xf32> to vector<8x128xf32>
    %c0_83 = arith.constant 0 : index
    %c0_84 = arith.constant 0 : index
    %192 = vector.load %arg5[%c0_83, %c0_84] : memref<32x128xf32, #tpu.memory_space<vmem>>, vector<32x128xf32>
    %cst_85 = arith.constant dense<0.000000e+00> : vector<8x128xf32>
    %193 = tpu.matmul %171, %192, %cst_85 {dimension_numbers = #tpu.dot_dimension_numbers<[1], [0], [0], [1], [0, 0, 1, 1], [], []>} : vector<8x32xf32>, vector<32x128xf32>, vector<8x128xf32> -> vector<8x128xf32>
    %194 = arith.addf %191, %193 : vector<8x128xf32>
    %195 = vector.extract_strided_slice %187 {offsets = [0, 0], sizes = [8, 32], strides = [1, 1]} : vector<8x128xf32> to vector<8x32xf32>
    %cst_86 = arith.constant 0.000000e+00 : f32
    %196 = vector.broadcast %cst_86 : f32 to vector<8x32xf32>
    %197 = arith.subf %196, %195 : vector<8x32xf32>
    %198 = math.exp %197 : vector<8x32xf32>
    %cst_87 = arith.constant 1.000000e+00 : f32
    %199 = vector.broadcast %cst_87 : f32 to vector<8x32xf32>
    %200 = arith.addf %199, %198 : vector<8x32xf32>
    %cst_88 = arith.constant 1.000000e+00 : f32
    %201 = vector.broadcast %cst_88 : f32 to vector<8x32xf32>
    %202 = arith.divf %201, %200 : vector<8x32xf32>
    %203 = vector.extract_strided_slice %187 {offsets = [0, 32], sizes = [8, 32], strides = [1, 1]} : vector<8x128xf32> to vector<8x32xf32>
    %cst_89 = arith.constant 0.000000e+00 : f32
    %204 = vector.broadcast %cst_89 : f32 to vector<8x32xf32>
    %205 = arith.subf %204, %203 : vector<8x32xf32>
    %206 = math.exp %205 : vector<8x32xf32>
    %cst_90 = arith.constant 1.000000e+00 : f32
    %207 = vector.broadcast %cst_90 : f32 to vector<8x32xf32>
    %208 = arith.addf %207, %206 : vector<8x32xf32>
    %cst_91 = arith.constant 1.000000e+00 : f32
    %209 = vector.broadcast %cst_91 : f32 to vector<8x32xf32>
    %210 = arith.divf %209, %208 : vector<8x32xf32>
    %211 = vector.extract_strided_slice %187 {offsets = [0, 64], sizes = [8, 32], strides = [1, 1]} : vector<8x128xf32> to vector<8x32xf32>
    %212 = math.tanh %211 : vector<8x32xf32>
    %213 = vector.extract_strided_slice %187 {offsets = [0, 96], sizes = [8, 32], strides = [1, 1]} : vector<8x128xf32> to vector<8x32xf32>
    %cst_92 = arith.constant 0.000000e+00 : f32
    %214 = vector.broadcast %cst_92 : f32 to vector<8x32xf32>
    %215 = arith.subf %214, %213 : vector<8x32xf32>
    %216 = math.exp %215 : vector<8x32xf32>
    %cst_93 = arith.constant 1.000000e+00 : f32
    %217 = vector.broadcast %cst_93 : f32 to vector<8x32xf32>
    %218 = arith.addf %217, %216 : vector<8x32xf32>
    %cst_94 = arith.constant 1.000000e+00 : f32
    %219 = vector.broadcast %cst_94 : f32 to vector<8x32xf32>
    %220 = arith.divf %219, %218 : vector<8x32xf32>
    %221 = arith.mulf %210, %138 : vector<8x32xf32>
    %222 = arith.mulf %202, %212 : vector<8x32xf32>
    %223 = arith.addf %221, %222 : vector<8x32xf32>
    %224 = math.tanh %223 : vector<8x32xf32>
    %225 = arith.mulf %220, %224 : vector<8x32xf32>
    %226 = vector.extract_strided_slice %194 {offsets = [0, 0], sizes = [8, 32], strides = [1, 1]} : vector<8x128xf32> to vector<8x32xf32>
    %cst_95 = arith.constant 0.000000e+00 : f32
    %227 = vector.broadcast %cst_95 : f32 to vector<8x32xf32>
    %228 = arith.subf %227, %226 : vector<8x32xf32>
    %229 = math.exp %228 : vector<8x32xf32>
    %cst_96 = arith.constant 1.000000e+00 : f32
    %230 = vector.broadcast %cst_96 : f32 to vector<8x32xf32>
    %231 = arith.addf %230, %229 : vector<8x32xf32>
    %cst_97 = arith.constant 1.000000e+00 : f32
    %232 = vector.broadcast %cst_97 : f32 to vector<8x32xf32>
    %233 = arith.divf %232, %231 : vector<8x32xf32>
    %234 = vector.extract_strided_slice %194 {offsets = [0, 32], sizes = [8, 32], strides = [1, 1]} : vector<8x128xf32> to vector<8x32xf32>
    %cst_98 = arith.constant 0.000000e+00 : f32
    %235 = vector.broadcast %cst_98 : f32 to vector<8x32xf32>
    %236 = arith.subf %235, %234 : vector<8x32xf32>
    %237 = math.exp %236 : vector<8x32xf32>
    %cst_99 = arith.constant 1.000000e+00 : f32
    %238 = vector.broadcast %cst_99 : f32 to vector<8x32xf32>
    %239 = arith.addf %238, %237 : vector<8x32xf32>
    %cst_100 = arith.constant 1.000000e+00 : f32
    %240 = vector.broadcast %cst_100 : f32 to vector<8x32xf32>
    %241 = arith.divf %240, %239 : vector<8x32xf32>
    %242 = vector.extract_strided_slice %194 {offsets = [0, 64], sizes = [8, 32], strides = [1, 1]} : vector<8x128xf32> to vector<8x32xf32>
    %243 = math.tanh %242 : vector<8x32xf32>
    %244 = vector.extract_strided_slice %194 {offsets = [0, 96], sizes = [8, 32], strides = [1, 1]} : vector<8x128xf32> to vector<8x32xf32>
    %cst_101 = arith.constant 0.000000e+00 : f32
    %245 = vector.broadcast %cst_101 : f32 to vector<8x32xf32>
    %246 = arith.subf %245, %244 : vector<8x32xf32>
    %247 = math.exp %246 : vector<8x32xf32>
    %cst_102 = arith.constant 1.000000e+00 : f32
    %248 = vector.broadcast %cst_102 : f32 to vector<8x32xf32>
    %249 = arith.addf %248, %247 : vector<8x32xf32>
    %cst_103 = arith.constant 1.000000e+00 : f32
    %250 = vector.broadcast %cst_103 : f32 to vector<8x32xf32>
    %251 = arith.divf %250, %249 : vector<8x32xf32>
    %252 = arith.mulf %241, %169 : vector<8x32xf32>
    %253 = arith.mulf %233, %243 : vector<8x32xf32>
    %254 = arith.addf %252, %253 : vector<8x32xf32>
    %255 = math.tanh %254 : vector<8x32xf32>
    %256 = arith.mulf %251, %255 : vector<8x32xf32>
    %257 = arith.index_cast %c2_i32 : i32 to index
    %c0_104 = arith.constant 0 : index
    %c0_105 = arith.constant 0 : index
    %258 = vector.load %arg6[%257, %c0_104, %c0_105] : memref<8x8x32xf32, #tpu.memory_space<vmem>>, vector<1x8x32xf32>
    %259 = vector.shape_cast %258 : vector<1x8x32xf32> to vector<8x32xf32>
    %260 = vector.shape_cast %225 : vector<8x32xf32> to vector<1x8x32xf32>
    tpu.vector_store %arg6[%257, %c0_104, %c0_105], %260 {strides = array<i32>} : memref<8x8x32xf32, #tpu.memory_space<vmem>>, vector<1x8x32xf32>,
    %261 = arith.index_cast %180 : i32 to index
    %c0_106 = arith.constant 0 : index
    %c0_107 = arith.constant 0 : index
    %262 = vector.load %arg7[%261, %c0_106, %c0_107] : memref<8x8x32xf32, #tpu.memory_space<vmem>>, vector<1x8x32xf32>
    %263 = vector.shape_cast %262 : vector<1x8x32xf32> to vector<8x32xf32>
    %264 = vector.shape_cast %256 : vector<8x32xf32> to vector<1x8x32xf32>
    tpu.vector_store %arg7[%261, %c0_106, %c0_107], %264 {strides = array<i32>} : memref<8x8x32xf32, #tpu.memory_space<vmem>>, vector<1x8x32xf32>,
    %c3_i32 = arith.constant 3 : i32
    %c7_i32_108 = arith.constant 7 : i32
    %265 = arith.subi %c7_i32_108, %c3_i32 : i32
    %266 = arith.index_cast %c3_i32 : i32 to index
    %c0_109 = arith.constant 0 : index
    %c0_110 = arith.constant 0 : index
    %267 = vector.load %arg8[%266, %c0_109, %c0_110] : memref<8x8x256xf32, #tpu.memory_space<vmem>>, vector<1x8x256xf32>
    %268 = vector.shape_cast %267 : vector<1x8x256xf32> to vector<8x256xf32>
    %269 = vector.extract_strided_slice %268 {offsets = [0, 0], sizes = [8, 128], strides = [1, 1]} : vector<8x256xf32> to vector<8x128xf32>
    %c0_111 = arith.constant 0 : index
    %c0_112 = arith.constant 0 : index
    %270 = vector.load %arg4[%c0_111, %c0_112] : memref<32x128xf32, #tpu.memory_space<vmem>>, vector<32x128xf32>
    %cst_113 = arith.constant dense<0.000000e+00> : vector<8x128xf32>
    %271 = tpu.matmul %225, %270, %cst_113 {dimension_numbers = #tpu.dot_dimension_numbers<[1], [0], [0], [1], [0, 0, 1, 1], [], []>} : vector<8x32xf32>, vector<32x128xf32>, vector<8x128xf32> -> vector<8x128xf32>
    %272 = arith.addf %269, %271 : vector<8x128xf32>
    %273 = arith.index_cast %265 : i32 to index
    %c0_114 = arith.constant 0 : index
    %c0_115 = arith.constant 0 : index
    %274 = vector.load %arg8[%273, %c0_114, %c0_115] : memref<8x8x256xf32, #tpu.memory_space<vmem>>, vector<1x8x256xf32>
    %275 = vector.shape_cast %274 : vector<1x8x256xf32> to vector<8x256xf32>
    %276 = vector.extract_strided_slice %275 {offsets = [0, 128], sizes = [8, 128], strides = [1, 1]} : vector<8x256xf32> to vector<8x128xf32>
    %c0_116 = arith.constant 0 : index
    %c0_117 = arith.constant 0 : index
    %277 = vector.load %arg5[%c0_116, %c0_117] : memref<32x128xf32, #tpu.memory_space<vmem>>, vector<32x128xf32>
    %cst_118 = arith.constant dense<0.000000e+00> : vector<8x128xf32>
    %278 = tpu.matmul %256, %277, %cst_118 {dimension_numbers = #tpu.dot_dimension_numbers<[1], [0], [0], [1], [0, 0, 1, 1], [], []>} : vector<8x32xf32>, vector<32x128xf32>, vector<8x128xf32> -> vector<8x128xf32>
    %279 = arith.addf %276, %278 : vector<8x128xf32>
    %280 = vector.extract_strided_slice %272 {offsets = [0, 0], sizes = [8, 32], strides = [1, 1]} : vector<8x128xf32> to vector<8x32xf32>
    %cst_119 = arith.constant 0.000000e+00 : f32
    %281 = vector.broadcast %cst_119 : f32 to vector<8x32xf32>
    %282 = arith.subf %281, %280 : vector<8x32xf32>
    %283 = math.exp %282 : vector<8x32xf32>
    %cst_120 = arith.constant 1.000000e+00 : f32
    %284 = vector.broadcast %cst_120 : f32 to vector<8x32xf32>
    %285 = arith.addf %284, %283 : vector<8x32xf32>
    %cst_121 = arith.constant 1.000000e+00 : f32
    %286 = vector.broadcast %cst_121 : f32 to vector<8x32xf32>
    %287 = arith.divf %286, %285 : vector<8x32xf32>
    %288 = vector.extract_strided_slice %272 {offsets = [0, 32], sizes = [8, 32], strides = [1, 1]} : vector<8x128xf32> to vector<8x32xf32>
    %cst_122 = arith.constant 0.000000e+00 : f32
    %289 = vector.broadcast %cst_122 : f32 to vector<8x32xf32>
    %290 = arith.subf %289, %288 : vector<8x32xf32>
    %291 = math.exp %290 : vector<8x32xf32>
    %cst_123 = arith.constant 1.000000e+00 : f32
    %292 = vector.broadcast %cst_123 : f32 to vector<8x32xf32>
    %293 = arith.addf %292, %291 : vector<8x32xf32>
    %cst_124 = arith.constant 1.000000e+00 : f32
    %294 = vector.broadcast %cst_124 : f32 to vector<8x32xf32>
    %295 = arith.divf %294, %293 : vector<8x32xf32>
    %296 = vector.extract_strided_slice %272 {offsets = [0, 64], sizes = [8, 32], strides = [1, 1]} : vector<8x128xf32> to vector<8x32xf32>
    %297 = math.tanh %296 : vector<8x32xf32>
    %298 = vector.extract_strided_slice %272 {offsets = [0, 96], sizes = [8, 32], strides = [1, 1]} : vector<8x128xf32> to vector<8x32xf32>
    %cst_125 = arith.constant 0.000000e+00 : f32
    %299 = vector.broadcast %cst_125 : f32 to vector<8x32xf32>
    %300 = arith.subf %299, %298 : vector<8x32xf32>
    %301 = math.exp %300 : vector<8x32xf32>
    %cst_126 = arith.constant 1.000000e+00 : f32
    %302 = vector.broadcast %cst_126 : f32 to vector<8x32xf32>
    %303 = arith.addf %302, %301 : vector<8x32xf32>
    %cst_127 = arith.constant 1.000000e+00 : f32
    %304 = vector.broadcast %cst_127 : f32 to vector<8x32xf32>
    %305 = arith.divf %304, %303 : vector<8x32xf32>
    %306 = arith.mulf %295, %223 : vector<8x32xf32>
    %307 = arith.mulf %287, %297 : vector<8x32xf32>
    %308 = arith.addf %306, %307 : vector<8x32xf32>
    %309 = math.tanh %308 : vector<8x32xf32>
    %310 = arith.mulf %305, %309 : vector<8x32xf32>
    %311 = vector.extract_strided_slice %279 {offsets = [0, 0], sizes = [8, 32], strides = [1, 1]} : vector<8x128xf32> to vector<8x32xf32>
    %cst_128 = arith.constant 0.000000e+00 : f32
    %312 = vector.broadcast %cst_128 : f32 to vector<8x32xf32>
    %313 = arith.subf %312, %311 : vector<8x32xf32>
    %314 = math.exp %313 : vector<8x32xf32>
    %cst_129 = arith.constant 1.000000e+00 : f32
    %315 = vector.broadcast %cst_129 : f32 to vector<8x32xf32>
    %316 = arith.addf %315, %314 : vector<8x32xf32>
    %cst_130 = arith.constant 1.000000e+00 : f32
    %317 = vector.broadcast %cst_130 : f32 to vector<8x32xf32>
    %318 = arith.divf %317, %316 : vector<8x32xf32>
    %319 = vector.extract_strided_slice %279 {offsets = [0, 32], sizes = [8, 32], strides = [1, 1]} : vector<8x128xf32> to vector<8x32xf32>
    %cst_131 = arith.constant 0.000000e+00 : f32
    %320 = vector.broadcast %cst_131 : f32 to vector<8x32xf32>
    %321 = arith.subf %320, %319 : vector<8x32xf32>
    %322 = math.exp %321 : vector<8x32xf32>
    %cst_132 = arith.constant 1.000000e+00 : f32
    %323 = vector.broadcast %cst_132 : f32 to vector<8x32xf32>
    %324 = arith.addf %323, %322 : vector<8x32xf32>
    %cst_133 = arith.constant 1.000000e+00 : f32
    %325 = vector.broadcast %cst_133 : f32 to vector<8x32xf32>
    %326 = arith.divf %325, %324 : vector<8x32xf32>
    %327 = vector.extract_strided_slice %279 {offsets = [0, 64], sizes = [8, 32], strides = [1, 1]} : vector<8x128xf32> to vector<8x32xf32>
    %328 = math.tanh %327 : vector<8x32xf32>
    %329 = vector.extract_strided_slice %279 {offsets = [0, 96], sizes = [8, 32], strides = [1, 1]} : vector<8x128xf32> to vector<8x32xf32>
    %cst_134 = arith.constant 0.000000e+00 : f32
    %330 = vector.broadcast %cst_134 : f32 to vector<8x32xf32>
    %331 = arith.subf %330, %329 : vector<8x32xf32>
    %332 = math.exp %331 : vector<8x32xf32>
    %cst_135 = arith.constant 1.000000e+00 : f32
    %333 = vector.broadcast %cst_135 : f32 to vector<8x32xf32>
    %334 = arith.addf %333, %332 : vector<8x32xf32>
    %cst_136 = arith.constant 1.000000e+00 : f32
    %335 = vector.broadcast %cst_136 : f32 to vector<8x32xf32>
    %336 = arith.divf %335, %334 : vector<8x32xf32>
    %337 = arith.mulf %326, %254 : vector<8x32xf32>
    %338 = arith.mulf %318, %328 : vector<8x32xf32>
    %339 = arith.addf %337, %338 : vector<8x32xf32>
    %340 = math.tanh %339 : vector<8x32xf32>
    %341 = arith.mulf %336, %340 : vector<8x32xf32>
    %342 = arith.index_cast %c3_i32 : i32 to index
    %c0_137 = arith.constant 0 : index
    %c0_138 = arith.constant 0 : index
    %343 = vector.load %arg6[%342, %c0_137, %c0_138] : memref<8x8x32xf32, #tpu.memory_space<vmem>>, vector<1x8x32xf32>
    %344 = vector.shape_cast %343 : vector<1x8x32xf32> to vector<8x32xf32>
    %345 = vector.shape_cast %310 : vector<8x32xf32> to vector<1x8x32xf32>
    tpu.vector_store %arg6[%342, %c0_137, %c0_138], %345 {strides = array<i32>} : memref<8x8x32xf32, #tpu.memory_space<vmem>>, vector<1x8x32xf32>,
    %346 = arith.index_cast %265 : i32 to index
    %c0_139 = arith.constant 0 : index
    %c0_140 = arith.constant 0 : index
    %347 = vector.load %arg7[%346, %c0_139, %c0_140] : memref<8x8x32xf32, #tpu.memory_space<vmem>>, vector<1x8x32xf32>
    %348 = vector.shape_cast %347 : vector<1x8x32xf32> to vector<8x32xf32>
    %349 = vector.shape_cast %341 : vector<8x32xf32> to vector<1x8x32xf32>
    tpu.vector_store %arg7[%346, %c0_139, %c0_140], %349 {strides = array<i32>} : memref<8x8x32xf32, #tpu.memory_space<vmem>>, vector<1x8x32xf32>,
    %c4_i32 = arith.constant 4 : i32
    %c7_i32_141 = arith.constant 7 : i32
    %350 = arith.subi %c7_i32_141, %c4_i32 : i32
    %351 = arith.index_cast %c4_i32 : i32 to index
    %c0_142 = arith.constant 0 : index
    %c0_143 = arith.constant 0 : index
    %352 = vector.load %arg8[%351, %c0_142, %c0_143] : memref<8x8x256xf32, #tpu.memory_space<vmem>>, vector<1x8x256xf32>
    %353 = vector.shape_cast %352 : vector<1x8x256xf32> to vector<8x256xf32>
    %354 = vector.extract_strided_slice %353 {offsets = [0, 0], sizes = [8, 128], strides = [1, 1]} : vector<8x256xf32> to vector<8x128xf32>
    %c0_144 = arith.constant 0 : index
    %c0_145 = arith.constant 0 : index
    %355 = vector.load %arg4[%c0_144, %c0_145] : memref<32x128xf32, #tpu.memory_space<vmem>>, vector<32x128xf32>
    %cst_146 = arith.constant dense<0.000000e+00> : vector<8x128xf32>
    %356 = tpu.matmul %310, %355, %cst_146 {dimension_numbers = #tpu.dot_dimension_numbers<[1], [0], [0], [1], [0, 0, 1, 1], [], []>} : vector<8x32xf32>, vector<32x128xf32>, vector<8x128xf32> -> vector<8x128xf32>
    %357 = arith.addf %354, %356 : vector<8x128xf32>
    %358 = arith.index_cast %350 : i32 to index
    %c0_147 = arith.constant 0 : index
    %c0_148 = arith.constant 0 : index
    %359 = vector.load %arg8[%358, %c0_147, %c0_148] : memref<8x8x256xf32, #tpu.memory_space<vmem>>, vector<1x8x256xf32>
    %360 = vector.shape_cast %359 : vector<1x8x256xf32> to vector<8x256xf32>
    %361 = vector.extract_strided_slice %360 {offsets = [0, 128], sizes = [8, 128], strides = [1, 1]} : vector<8x256xf32> to vector<8x128xf32>
    %c0_149 = arith.constant 0 : index
    %c0_150 = arith.constant 0 : index
    %362 = vector.load %arg5[%c0_149, %c0_150] : memref<32x128xf32, #tpu.memory_space<vmem>>, vector<32x128xf32>
    %cst_151 = arith.constant dense<0.000000e+00> : vector<8x128xf32>
    %363 = tpu.matmul %341, %362, %cst_151 {dimension_numbers = #tpu.dot_dimension_numbers<[1], [0], [0], [1], [0, 0, 1, 1], [], []>} : vector<8x32xf32>, vector<32x128xf32>, vector<8x128xf32> -> vector<8x128xf32>
    %364 = arith.addf %361, %363 : vector<8x128xf32>
    %365 = vector.extract_strided_slice %357 {offsets = [0, 0], sizes = [8, 32], strides = [1, 1]} : vector<8x128xf32> to vector<8x32xf32>
    %cst_152 = arith.constant 0.000000e+00 : f32
    %366 = vector.broadcast %cst_152 : f32 to vector<8x32xf32>
    %367 = arith.subf %366, %365 : vector<8x32xf32>
    %368 = math.exp %367 : vector<8x32xf32>
    %cst_153 = arith.constant 1.000000e+00 : f32
    %369 = vector.broadcast %cst_153 : f32 to vector<8x32xf32>
    %370 = arith.addf %369, %368 : vector<8x32xf32>
    %cst_154 = arith.constant 1.000000e+00 : f32
    %371 = vector.broadcast %cst_154 : f32 to vector<8x32xf32>
    %372 = arith.divf %371, %370 : vector<8x32xf32>
    %373 = vector.extract_strided_slice %357 {offsets = [0, 32], sizes = [8, 32], strides = [1, 1]} : vector<8x128xf32> to vector<8x32xf32>
    %cst_155 = arith.constant 0.000000e+00 : f32
    %374 = vector.broadcast %cst_155 : f32 to vector<8x32xf32>
    %375 = arith.subf %374, %373 : vector<8x32xf32>
    %376 = math.exp %375 : vector<8x32xf32>
    %cst_156 = arith.constant 1.000000e+00 : f32
    %377 = vector.broadcast %cst_156 : f32 to vector<8x32xf32>
    %378 = arith.addf %377, %376 : vector<8x32xf32>
    %cst_157 = arith.constant 1.000000e+00 : f32
    %379 = vector.broadcast %cst_157 : f32 to vector<8x32xf32>
    %380 = arith.divf %379, %378 : vector<8x32xf32>
    %381 = vector.extract_strided_slice %357 {offsets = [0, 64], sizes = [8, 32], strides = [1, 1]} : vector<8x128xf32> to vector<8x32xf32>
    %382 = math.tanh %381 : vector<8x32xf32>
    %383 = vector.extract_strided_slice %357 {offsets = [0, 96], sizes = [8, 32], strides = [1, 1]} : vector<8x128xf32> to vector<8x32xf32>
    %cst_158 = arith.constant 0.000000e+00 : f32
    %384 = vector.broadcast %cst_158 : f32 to vector<8x32xf32>
    %385 = arith.subf %384, %383 : vector<8x32xf32>
    %386 = math.exp %385 : vector<8x32xf32>
    %cst_159 = arith.constant 1.000000e+00 : f32
    %387 = vector.broadcast %cst_159 : f32 to vector<8x32xf32>
    %388 = arith.addf %387, %386 : vector<8x32xf32>
    %cst_160 = arith.constant 1.000000e+00 : f32
    %389 = vector.broadcast %cst_160 : f32 to vector<8x32xf32>
    %390 = arith.divf %389, %388 : vector<8x32xf32>
    %391 = arith.mulf %380, %308 : vector<8x32xf32>
    %392 = arith.mulf %372, %382 : vector<8x32xf32>
    %393 = arith.addf %391, %392 : vector<8x32xf32>
    %394 = math.tanh %393 : vector<8x32xf32>
    %395 = arith.mulf %390, %394 : vector<8x32xf32>
    %396 = vector.extract_strided_slice %364 {offsets = [0, 0], sizes = [8, 32], strides = [1, 1]} : vector<8x128xf32> to vector<8x32xf32>
    %cst_161 = arith.constant 0.000000e+00 : f32
    %397 = vector.broadcast %cst_161 : f32 to vector<8x32xf32>
    %398 = arith.subf %397, %396 : vector<8x32xf32>
    %399 = math.exp %398 : vector<8x32xf32>
    %cst_162 = arith.constant 1.000000e+00 : f32
    %400 = vector.broadcast %cst_162 : f32 to vector<8x32xf32>
    %401 = arith.addf %400, %399 : vector<8x32xf32>
    %cst_163 = arith.constant 1.000000e+00 : f32
    %402 = vector.broadcast %cst_163 : f32 to vector<8x32xf32>
    %403 = arith.divf %402, %401 : vector<8x32xf32>
    %404 = vector.extract_strided_slice %364 {offsets = [0, 32], sizes = [8, 32], strides = [1, 1]} : vector<8x128xf32> to vector<8x32xf32>
    %cst_164 = arith.constant 0.000000e+00 : f32
    %405 = vector.broadcast %cst_164 : f32 to vector<8x32xf32>
    %406 = arith.subf %405, %404 : vector<8x32xf32>
    %407 = math.exp %406 : vector<8x32xf32>
    %cst_165 = arith.constant 1.000000e+00 : f32
    %408 = vector.broadcast %cst_165 : f32 to vector<8x32xf32>
    %409 = arith.addf %408, %407 : vector<8x32xf32>
    %cst_166 = arith.constant 1.000000e+00 : f32
    %410 = vector.broadcast %cst_166 : f32 to vector<8x32xf32>
    %411 = arith.divf %410, %409 : vector<8x32xf32>
    %412 = vector.extract_strided_slice %364 {offsets = [0, 64], sizes = [8, 32], strides = [1, 1]} : vector<8x128xf32> to vector<8x32xf32>
    %413 = math.tanh %412 : vector<8x32xf32>
    %414 = vector.extract_strided_slice %364 {offsets = [0, 96], sizes = [8, 32], strides = [1, 1]} : vector<8x128xf32> to vector<8x32xf32>
    %cst_167 = arith.constant 0.000000e+00 : f32
    %415 = vector.broadcast %cst_167 : f32 to vector<8x32xf32>
    %416 = arith.subf %415, %414 : vector<8x32xf32>
    %417 = math.exp %416 : vector<8x32xf32>
    %cst_168 = arith.constant 1.000000e+00 : f32
    %418 = vector.broadcast %cst_168 : f32 to vector<8x32xf32>
    %419 = arith.addf %418, %417 : vector<8x32xf32>
    %cst_169 = arith.constant 1.000000e+00 : f32
    %420 = vector.broadcast %cst_169 : f32 to vector<8x32xf32>
    %421 = arith.divf %420, %419 : vector<8x32xf32>
    %422 = arith.mulf %411, %339 : vector<8x32xf32>
    %423 = arith.mulf %403, %413 : vector<8x32xf32>
    %424 = arith.addf %422, %423 : vector<8x32xf32>
    %425 = math.tanh %424 : vector<8x32xf32>
    %426 = arith.mulf %421, %425 : vector<8x32xf32>
    %427 = arith.index_cast %c4_i32 : i32 to index
    %c0_170 = arith.constant 0 : index
    %c0_171 = arith.constant 0 : index
    %428 = vector.load %arg6[%427, %c0_170, %c0_171] : memref<8x8x32xf32, #tpu.memory_space<vmem>>, vector<1x8x32xf32>
    %429 = vector.shape_cast %428 : vector<1x8x32xf32> to vector<8x32xf32>
    %430 = vector.shape_cast %395 : vector<8x32xf32> to vector<1x8x32xf32>
    tpu.vector_store %arg6[%427, %c0_170, %c0_171], %430 {strides = array<i32>} : memref<8x8x32xf32, #tpu.memory_space<vmem>>, vector<1x8x32xf32>,
    %431 = arith.index_cast %350 : i32 to index
    %c0_172 = arith.constant 0 : index
    %c0_173 = arith.constant 0 : index
    %432 = vector.load %arg7[%431, %c0_172, %c0_173] : memref<8x8x32xf32, #tpu.memory_space<vmem>>, vector<1x8x32xf32>
    %433 = vector.shape_cast %432 : vector<1x8x32xf32> to vector<8x32xf32>
    %434 = vector.shape_cast %426 : vector<8x32xf32> to vector<1x8x32xf32>
    tpu.vector_store %arg7[%431, %c0_172, %c0_173], %434 {strides = array<i32>} : memref<8x8x32xf32, #tpu.memory_space<vmem>>, vector<1x8x32xf32>,
    %c5_i32 = arith.constant 5 : i32
    %c7_i32_174 = arith.constant 7 : i32
    %435 = arith.subi %c7_i32_174, %c5_i32 : i32
    %436 = arith.index_cast %c5_i32 : i32 to index
    %c0_175 = arith.constant 0 : index
    %c0_176 = arith.constant 0 : index
    %437 = vector.load %arg8[%436, %c0_175, %c0_176] : memref<8x8x256xf32, #tpu.memory_space<vmem>>, vector<1x8x256xf32>
    %438 = vector.shape_cast %437 : vector<1x8x256xf32> to vector<8x256xf32>
    %439 = vector.extract_strided_slice %438 {offsets = [0, 0], sizes = [8, 128], strides = [1, 1]} : vector<8x256xf32> to vector<8x128xf32>
    %c0_177 = arith.constant 0 : index
    %c0_178 = arith.constant 0 : index
    %440 = vector.load %arg4[%c0_177, %c0_178] : memref<32x128xf32, #tpu.memory_space<vmem>>, vector<32x128xf32>
    %cst_179 = arith.constant dense<0.000000e+00> : vector<8x128xf32>
    %441 = tpu.matmul %395, %440, %cst_179 {dimension_numbers = #tpu.dot_dimension_numbers<[1], [0], [0], [1], [0, 0, 1, 1], [], []>} : vector<8x32xf32>, vector<32x128xf32>, vector<8x128xf32> -> vector<8x128xf32>
    %442 = arith.addf %439, %441 : vector<8x128xf32>
    %443 = arith.index_cast %435 : i32 to index
    %c0_180 = arith.constant 0 : index
    %c0_181 = arith.constant 0 : index
    %444 = vector.load %arg8[%443, %c0_180, %c0_181] : memref<8x8x256xf32, #tpu.memory_space<vmem>>, vector<1x8x256xf32>
    %445 = vector.shape_cast %444 : vector<1x8x256xf32> to vector<8x256xf32>
    %446 = vector.extract_strided_slice %445 {offsets = [0, 128], sizes = [8, 128], strides = [1, 1]} : vector<8x256xf32> to vector<8x128xf32>
    %c0_182 = arith.constant 0 : index
    %c0_183 = arith.constant 0 : index
    %447 = vector.load %arg5[%c0_182, %c0_183] : memref<32x128xf32, #tpu.memory_space<vmem>>, vector<32x128xf32>
    %cst_184 = arith.constant dense<0.000000e+00> : vector<8x128xf32>
    %448 = tpu.matmul %426, %447, %cst_184 {dimension_numbers = #tpu.dot_dimension_numbers<[1], [0], [0], [1], [0, 0, 1, 1], [], []>} : vector<8x32xf32>, vector<32x128xf32>, vector<8x128xf32> -> vector<8x128xf32>
    %449 = arith.addf %446, %448 : vector<8x128xf32>
    %450 = vector.extract_strided_slice %442 {offsets = [0, 0], sizes = [8, 32], strides = [1, 1]} : vector<8x128xf32> to vector<8x32xf32>
    %cst_185 = arith.constant 0.000000e+00 : f32
    %451 = vector.broadcast %cst_185 : f32 to vector<8x32xf32>
    %452 = arith.subf %451, %450 : vector<8x32xf32>
    %453 = math.exp %452 : vector<8x32xf32>
    %cst_186 = arith.constant 1.000000e+00 : f32
    %454 = vector.broadcast %cst_186 : f32 to vector<8x32xf32>
    %455 = arith.addf %454, %453 : vector<8x32xf32>
    %cst_187 = arith.constant 1.000000e+00 : f32
    %456 = vector.broadcast %cst_187 : f32 to vector<8x32xf32>
    %457 = arith.divf %456, %455 : vector<8x32xf32>
    %458 = vector.extract_strided_slice %442 {offsets = [0, 32], sizes = [8, 32], strides = [1, 1]} : vector<8x128xf32> to vector<8x32xf32>
    %cst_188 = arith.constant 0.000000e+00 : f32
    %459 = vector.broadcast %cst_188 : f32 to vector<8x32xf32>
    %460 = arith.subf %459, %458 : vector<8x32xf32>
    %461 = math.exp %460 : vector<8x32xf32>
    %cst_189 = arith.constant 1.000000e+00 : f32
    %462 = vector.broadcast %cst_189 : f32 to vector<8x32xf32>
    %463 = arith.addf %462, %461 : vector<8x32xf32>
    %cst_190 = arith.constant 1.000000e+00 : f32
    %464 = vector.broadcast %cst_190 : f32 to vector<8x32xf32>
    %465 = arith.divf %464, %463 : vector<8x32xf32>
    %466 = vector.extract_strided_slice %442 {offsets = [0, 64], sizes = [8, 32], strides = [1, 1]} : vector<8x128xf32> to vector<8x32xf32>
    %467 = math.tanh %466 : vector<8x32xf32>
    %468 = vector.extract_strided_slice %442 {offsets = [0, 96], sizes = [8, 32], strides = [1, 1]} : vector<8x128xf32> to vector<8x32xf32>
    %cst_191 = arith.constant 0.000000e+00 : f32
    %469 = vector.broadcast %cst_191 : f32 to vector<8x32xf32>
    %470 = arith.subf %469, %468 : vector<8x32xf32>
    %471 = math.exp %470 : vector<8x32xf32>
    %cst_192 = arith.constant 1.000000e+00 : f32
    %472 = vector.broadcast %cst_192 : f32 to vector<8x32xf32>
    %473 = arith.addf %472, %471 : vector<8x32xf32>
    %cst_193 = arith.constant 1.000000e+00 : f32
    %474 = vector.broadcast %cst_193 : f32 to vector<8x32xf32>
    %475 = arith.divf %474, %473 : vector<8x32xf32>
    %476 = arith.mulf %465, %393 : vector<8x32xf32>
    %477 = arith.mulf %457, %467 : vector<8x32xf32>
    %478 = arith.addf %476, %477 : vector<8x32xf32>
    %479 = math.tanh %478 : vector<8x32xf32>
    %480 = arith.mulf %475, %479 : vector<8x32xf32>
    %481 = vector.extract_strided_slice %449 {offsets = [0, 0], sizes = [8, 32], strides = [1, 1]} : vector<8x128xf32> to vector<8x32xf32>
    %cst_194 = arith.constant 0.000000e+00 : f32
    %482 = vector.broadcast %cst_194 : f32 to vector<8x32xf32>
    %483 = arith.subf %482, %481 : vector<8x32xf32>
    %484 = math.exp %483 : vector<8x32xf32>
    %cst_195 = arith.constant 1.000000e+00 : f32
    %485 = vector.broadcast %cst_195 : f32 to vector<8x32xf32>
    %486 = arith.addf %485, %484 : vector<8x32xf32>
    %cst_196 = arith.constant 1.000000e+00 : f32
    %487 = vector.broadcast %cst_196 : f32 to vector<8x32xf32>
    %488 = arith.divf %487, %486 : vector<8x32xf32>
    %489 = vector.extract_strided_slice %449 {offsets = [0, 32], sizes = [8, 32], strides = [1, 1]} : vector<8x128xf32> to vector<8x32xf32>
    %cst_197 = arith.constant 0.000000e+00 : f32
    %490 = vector.broadcast %cst_197 : f32 to vector<8x32xf32>
    %491 = arith.subf %490, %489 : vector<8x32xf32>
    %492 = math.exp %491 : vector<8x32xf32>
    %cst_198 = arith.constant 1.000000e+00 : f32
    %493 = vector.broadcast %cst_198 : f32 to vector<8x32xf32>
    %494 = arith.addf %493, %492 : vector<8x32xf32>
    %cst_199 = arith.constant 1.000000e+00 : f32
    %495 = vector.broadcast %cst_199 : f32 to vector<8x32xf32>
    %496 = arith.divf %495, %494 : vector<8x32xf32>
    %497 = vector.extract_strided_slice %449 {offsets = [0, 64], sizes = [8, 32], strides = [1, 1]} : vector<8x128xf32> to vector<8x32xf32>
    %498 = math.tanh %497 : vector<8x32xf32>
    %499 = vector.extract_strided_slice %449 {offsets = [0, 96], sizes = [8, 32], strides = [1, 1]} : vector<8x128xf32> to vector<8x32xf32>
    %cst_200 = arith.constant 0.000000e+00 : f32
    %500 = vector.broadcast %cst_200 : f32 to vector<8x32xf32>
    %501 = arith.subf %500, %499 : vector<8x32xf32>
    %502 = math.exp %501 : vector<8x32xf32>
    %cst_201 = arith.constant 1.000000e+00 : f32
    %503 = vector.broadcast %cst_201 : f32 to vector<8x32xf32>
    %504 = arith.addf %503, %502 : vector<8x32xf32>
    %cst_202 = arith.constant 1.000000e+00 : f32
    %505 = vector.broadcast %cst_202 : f32 to vector<8x32xf32>
    %506 = arith.divf %505, %504 : vector<8x32xf32>
    %507 = arith.mulf %496, %424 : vector<8x32xf32>
    %508 = arith.mulf %488, %498 : vector<8x32xf32>
    %509 = arith.addf %507, %508 : vector<8x32xf32>
    %510 = math.tanh %509 : vector<8x32xf32>
    %511 = arith.mulf %506, %510 : vector<8x32xf32>
    %512 = arith.index_cast %c5_i32 : i32 to index
    %c0_203 = arith.constant 0 : index
    %c0_204 = arith.constant 0 : index
    %513 = vector.load %arg6[%512, %c0_203, %c0_204] : memref<8x8x32xf32, #tpu.memory_space<vmem>>, vector<1x8x32xf32>
    %514 = vector.shape_cast %513 : vector<1x8x32xf32> to vector<8x32xf32>
    %515 = vector.shape_cast %480 : vector<8x32xf32> to vector<1x8x32xf32>
    tpu.vector_store %arg6[%512, %c0_203, %c0_204], %515 {strides = array<i32>} : memref<8x8x32xf32, #tpu.memory_space<vmem>>, vector<1x8x32xf32>,
    %516 = arith.index_cast %435 : i32 to index
    %c0_205 = arith.constant 0 : index
    %c0_206 = arith.constant 0 : index
    %517 = vector.load %arg7[%516, %c0_205, %c0_206] : memref<8x8x32xf32, #tpu.memory_space<vmem>>, vector<1x8x32xf32>
    %518 = vector.shape_cast %517 : vector<1x8x32xf32> to vector<8x32xf32>
    %519 = vector.shape_cast %511 : vector<8x32xf32> to vector<1x8x32xf32>
    tpu.vector_store %arg7[%516, %c0_205, %c0_206], %519 {strides = array<i32>} : memref<8x8x32xf32, #tpu.memory_space<vmem>>, vector<1x8x32xf32>,
    %c6_i32 = arith.constant 6 : i32
    %c7_i32_207 = arith.constant 7 : i32
    %520 = arith.subi %c7_i32_207, %c6_i32 : i32
    %521 = arith.index_cast %c6_i32 : i32 to index
    %c0_208 = arith.constant 0 : index
    %c0_209 = arith.constant 0 : index
    %522 = vector.load %arg8[%521, %c0_208, %c0_209] : memref<8x8x256xf32, #tpu.memory_space<vmem>>, vector<1x8x256xf32>
    %523 = vector.shape_cast %522 : vector<1x8x256xf32> to vector<8x256xf32>
    %524 = vector.extract_strided_slice %523 {offsets = [0, 0], sizes = [8, 128], strides = [1, 1]} : vector<8x256xf32> to vector<8x128xf32>
    %c0_210 = arith.constant 0 : index
    %c0_211 = arith.constant 0 : index
    %525 = vector.load %arg4[%c0_210, %c0_211] : memref<32x128xf32, #tpu.memory_space<vmem>>, vector<32x128xf32>
    %cst_212 = arith.constant dense<0.000000e+00> : vector<8x128xf32>
    %526 = tpu.matmul %480, %525, %cst_212 {dimension_numbers = #tpu.dot_dimension_numbers<[1], [0], [0], [1], [0, 0, 1, 1], [], []>} : vector<8x32xf32>, vector<32x128xf32>, vector<8x128xf32> -> vector<8x128xf32>
    %527 = arith.addf %524, %526 : vector<8x128xf32>
    %528 = arith.index_cast %520 : i32 to index
    %c0_213 = arith.constant 0 : index
    %c0_214 = arith.constant 0 : index
    %529 = vector.load %arg8[%528, %c0_213, %c0_214] : memref<8x8x256xf32, #tpu.memory_space<vmem>>, vector<1x8x256xf32>
    %530 = vector.shape_cast %529 : vector<1x8x256xf32> to vector<8x256xf32>
    %531 = vector.extract_strided_slice %530 {offsets = [0, 128], sizes = [8, 128], strides = [1, 1]} : vector<8x256xf32> to vector<8x128xf32>
    %c0_215 = arith.constant 0 : index
    %c0_216 = arith.constant 0 : index
    %532 = vector.load %arg5[%c0_215, %c0_216] : memref<32x128xf32, #tpu.memory_space<vmem>>, vector<32x128xf32>
    %cst_217 = arith.constant dense<0.000000e+00> : vector<8x128xf32>
    %533 = tpu.matmul %511, %532, %cst_217 {dimension_numbers = #tpu.dot_dimension_numbers<[1], [0], [0], [1], [0, 0, 1, 1], [], []>} : vector<8x32xf32>, vector<32x128xf32>, vector<8x128xf32> -> vector<8x128xf32>
    %534 = arith.addf %531, %533 : vector<8x128xf32>
    %535 = vector.extract_strided_slice %527 {offsets = [0, 0], sizes = [8, 32], strides = [1, 1]} : vector<8x128xf32> to vector<8x32xf32>
    %cst_218 = arith.constant 0.000000e+00 : f32
    %536 = vector.broadcast %cst_218 : f32 to vector<8x32xf32>
    %537 = arith.subf %536, %535 : vector<8x32xf32>
    %538 = math.exp %537 : vector<8x32xf32>
    %cst_219 = arith.constant 1.000000e+00 : f32
    %539 = vector.broadcast %cst_219 : f32 to vector<8x32xf32>
    %540 = arith.addf %539, %538 : vector<8x32xf32>
    %cst_220 = arith.constant 1.000000e+00 : f32
    %541 = vector.broadcast %cst_220 : f32 to vector<8x32xf32>
    %542 = arith.divf %541, %540 : vector<8x32xf32>
    %543 = vector.extract_strided_slice %527 {offsets = [0, 32], sizes = [8, 32], strides = [1, 1]} : vector<8x128xf32> to vector<8x32xf32>
    %cst_221 = arith.constant 0.000000e+00 : f32
    %544 = vector.broadcast %cst_221 : f32 to vector<8x32xf32>
    %545 = arith.subf %544, %543 : vector<8x32xf32>
    %546 = math.exp %545 : vector<8x32xf32>
    %cst_222 = arith.constant 1.000000e+00 : f32
    %547 = vector.broadcast %cst_222 : f32 to vector<8x32xf32>
    %548 = arith.addf %547, %546 : vector<8x32xf32>
    %cst_223 = arith.constant 1.000000e+00 : f32
    %549 = vector.broadcast %cst_223 : f32 to vector<8x32xf32>
    %550 = arith.divf %549, %548 : vector<8x32xf32>
    %551 = vector.extract_strided_slice %527 {offsets = [0, 64], sizes = [8, 32], strides = [1, 1]} : vector<8x128xf32> to vector<8x32xf32>
    %552 = math.tanh %551 : vector<8x32xf32>
    %553 = vector.extract_strided_slice %527 {offsets = [0, 96], sizes = [8, 32], strides = [1, 1]} : vector<8x128xf32> to vector<8x32xf32>
    %cst_224 = arith.constant 0.000000e+00 : f32
    %554 = vector.broadcast %cst_224 : f32 to vector<8x32xf32>
    %555 = arith.subf %554, %553 : vector<8x32xf32>
    %556 = math.exp %555 : vector<8x32xf32>
    %cst_225 = arith.constant 1.000000e+00 : f32
    %557 = vector.broadcast %cst_225 : f32 to vector<8x32xf32>
    %558 = arith.addf %557, %556 : vector<8x32xf32>
    %cst_226 = arith.constant 1.000000e+00 : f32
    %559 = vector.broadcast %cst_226 : f32 to vector<8x32xf32>
    %560 = arith.divf %559, %558 : vector<8x32xf32>
    %561 = arith.mulf %550, %478 : vector<8x32xf32>
    %562 = arith.mulf %542, %552 : vector<8x32xf32>
    %563 = arith.addf %561, %562 : vector<8x32xf32>
    %564 = math.tanh %563 : vector<8x32xf32>
    %565 = arith.mulf %560, %564 : vector<8x32xf32>
    %566 = vector.extract_strided_slice %534 {offsets = [0, 0], sizes = [8, 32], strides = [1, 1]} : vector<8x128xf32> to vector<8x32xf32>
    %cst_227 = arith.constant 0.000000e+00 : f32
    %567 = vector.broadcast %cst_227 : f32 to vector<8x32xf32>
    %568 = arith.subf %567, %566 : vector<8x32xf32>
    %569 = math.exp %568 : vector<8x32xf32>
    %cst_228 = arith.constant 1.000000e+00 : f32
    %570 = vector.broadcast %cst_228 : f32 to vector<8x32xf32>
    %571 = arith.addf %570, %569 : vector<8x32xf32>
    %cst_229 = arith.constant 1.000000e+00 : f32
    %572 = vector.broadcast %cst_229 : f32 to vector<8x32xf32>
    %573 = arith.divf %572, %571 : vector<8x32xf32>
    %574 = vector.extract_strided_slice %534 {offsets = [0, 32], sizes = [8, 32], strides = [1, 1]} : vector<8x128xf32> to vector<8x32xf32>
    %cst_230 = arith.constant 0.000000e+00 : f32
    %575 = vector.broadcast %cst_230 : f32 to vector<8x32xf32>
    %576 = arith.subf %575, %574 : vector<8x32xf32>
    %577 = math.exp %576 : vector<8x32xf32>
    %cst_231 = arith.constant 1.000000e+00 : f32
    %578 = vector.broadcast %cst_231 : f32 to vector<8x32xf32>
    %579 = arith.addf %578, %577 : vector<8x32xf32>
    %cst_232 = arith.constant 1.000000e+00 : f32
    %580 = vector.broadcast %cst_232 : f32 to vector<8x32xf32>
    %581 = arith.divf %580, %579 : vector<8x32xf32>
    %582 = vector.extract_strided_slice %534 {offsets = [0, 64], sizes = [8, 32], strides = [1, 1]} : vector<8x128xf32> to vector<8x32xf32>
    %583 = math.tanh %582 : vector<8x32xf32>
    %584 = vector.extract_strided_slice %534 {offsets = [0, 96], sizes = [8, 32], strides = [1, 1]} : vector<8x128xf32> to vector<8x32xf32>
    %cst_233 = arith.constant 0.000000e+00 : f32
    %585 = vector.broadcast %cst_233 : f32 to vector<8x32xf32>
    %586 = arith.subf %585, %584 : vector<8x32xf32>
    %587 = math.exp %586 : vector<8x32xf32>
    %cst_234 = arith.constant 1.000000e+00 : f32
    %588 = vector.broadcast %cst_234 : f32 to vector<8x32xf32>
    %589 = arith.addf %588, %587 : vector<8x32xf32>
    %cst_235 = arith.constant 1.000000e+00 : f32
    %590 = vector.broadcast %cst_235 : f32 to vector<8x32xf32>
    %591 = arith.divf %590, %589 : vector<8x32xf32>
    %592 = arith.mulf %581, %509 : vector<8x32xf32>
    %593 = arith.mulf %573, %583 : vector<8x32xf32>
    %594 = arith.addf %592, %593 : vector<8x32xf32>
    %595 = math.tanh %594 : vector<8x32xf32>
    %596 = arith.mulf %591, %595 : vector<8x32xf32>
    %597 = arith.index_cast %c6_i32 : i32 to index
    %c0_236 = arith.constant 0 : index
    %c0_237 = arith.constant 0 : index
    %598 = vector.load %arg6[%597, %c0_236, %c0_237] : memref<8x8x32xf32, #tpu.memory_space<vmem>>, vector<1x8x32xf32>
    %599 = vector.shape_cast %598 : vector<1x8x32xf32> to vector<8x32xf32>
    %600 = vector.shape_cast %565 : vector<8x32xf32> to vector<1x8x32xf32>
    tpu.vector_store %arg6[%597, %c0_236, %c0_237], %600 {strides = array<i32>} : memref<8x8x32xf32, #tpu.memory_space<vmem>>, vector<1x8x32xf32>,
    %601 = arith.index_cast %520 : i32 to index
    %c0_238 = arith.constant 0 : index
    %c0_239 = arith.constant 0 : index
    %602 = vector.load %arg7[%601, %c0_238, %c0_239] : memref<8x8x32xf32, #tpu.memory_space<vmem>>, vector<1x8x32xf32>
    %603 = vector.shape_cast %602 : vector<1x8x32xf32> to vector<8x32xf32>
    %604 = vector.shape_cast %596 : vector<8x32xf32> to vector<1x8x32xf32>
    tpu.vector_store %arg7[%601, %c0_238, %c0_239], %604 {strides = array<i32>} : memref<8x8x32xf32, #tpu.memory_space<vmem>>, vector<1x8x32xf32>,
    %c7_i32_240 = arith.constant 7 : i32
    %c7_i32_241 = arith.constant 7 : i32
    %605 = arith.subi %c7_i32_241, %c7_i32_240 : i32
    %606 = arith.index_cast %c7_i32_240 : i32 to index
    %c0_242 = arith.constant 0 : index
    %c0_243 = arith.constant 0 : index
    %607 = vector.load %arg8[%606, %c0_242, %c0_243] : memref<8x8x256xf32, #tpu.memory_space<vmem>>, vector<1x8x256xf32>
    %608 = vector.shape_cast %607 : vector<1x8x256xf32> to vector<8x256xf32>
    %609 = vector.extract_strided_slice %608 {offsets = [0, 0], sizes = [8, 128], strides = [1, 1]} : vector<8x256xf32> to vector<8x128xf32>
    %c0_244 = arith.constant 0 : index
    %c0_245 = arith.constant 0 : index
    %610 = vector.load %arg4[%c0_244, %c0_245] : memref<32x128xf32, #tpu.memory_space<vmem>>, vector<32x128xf32>
    %cst_246 = arith.constant dense<0.000000e+00> : vector<8x128xf32>
    %611 = tpu.matmul %565, %610, %cst_246 {dimension_numbers = #tpu.dot_dimension_numbers<[1], [0], [0], [1], [0, 0, 1, 1], [], []>} : vector<8x32xf32>, vector<32x128xf32>, vector<8x128xf32> -> vector<8x128xf32>
    %612 = arith.addf %609, %611 : vector<8x128xf32>
    %613 = arith.index_cast %605 : i32 to index
    %c0_247 = arith.constant 0 : index
    %c0_248 = arith.constant 0 : index
    %614 = vector.load %arg8[%613, %c0_247, %c0_248] : memref<8x8x256xf32, #tpu.memory_space<vmem>>, vector<1x8x256xf32>
    %615 = vector.shape_cast %614 : vector<1x8x256xf32> to vector<8x256xf32>
    %616 = vector.extract_strided_slice %615 {offsets = [0, 128], sizes = [8, 128], strides = [1, 1]} : vector<8x256xf32> to vector<8x128xf32>
    %c0_249 = arith.constant 0 : index
    %c0_250 = arith.constant 0 : index
    %617 = vector.load %arg5[%c0_249, %c0_250] : memref<32x128xf32, #tpu.memory_space<vmem>>, vector<32x128xf32>
    %cst_251 = arith.constant dense<0.000000e+00> : vector<8x128xf32>
    %618 = tpu.matmul %596, %617, %cst_251 {dimension_numbers = #tpu.dot_dimension_numbers<[1], [0], [0], [1], [0, 0, 1, 1], [], []>} : vector<8x32xf32>, vector<32x128xf32>, vector<8x128xf32> -> vector<8x128xf32>
    %619 = arith.addf %616, %618 : vector<8x128xf32>
    %620 = vector.extract_strided_slice %612 {offsets = [0, 0], sizes = [8, 32], strides = [1, 1]} : vector<8x128xf32> to vector<8x32xf32>
    %cst_252 = arith.constant 0.000000e+00 : f32
    %621 = vector.broadcast %cst_252 : f32 to vector<8x32xf32>
    %622 = arith.subf %621, %620 : vector<8x32xf32>
    %623 = math.exp %622 : vector<8x32xf32>
    %cst_253 = arith.constant 1.000000e+00 : f32
    %624 = vector.broadcast %cst_253 : f32 to vector<8x32xf32>
    %625 = arith.addf %624, %623 : vector<8x32xf32>
    %cst_254 = arith.constant 1.000000e+00 : f32
    %626 = vector.broadcast %cst_254 : f32 to vector<8x32xf32>
    %627 = arith.divf %626, %625 : vector<8x32xf32>
    %628 = vector.extract_strided_slice %612 {offsets = [0, 32], sizes = [8, 32], strides = [1, 1]} : vector<8x128xf32> to vector<8x32xf32>
    %cst_255 = arith.constant 0.000000e+00 : f32
    %629 = vector.broadcast %cst_255 : f32 to vector<8x32xf32>
    %630 = arith.subf %629, %628 : vector<8x32xf32>
    %631 = math.exp %630 : vector<8x32xf32>
    %cst_256 = arith.constant 1.000000e+00 : f32
    %632 = vector.broadcast %cst_256 : f32 to vector<8x32xf32>
    %633 = arith.addf %632, %631 : vector<8x32xf32>
    %cst_257 = arith.constant 1.000000e+00 : f32
    %634 = vector.broadcast %cst_257 : f32 to vector<8x32xf32>
    %635 = arith.divf %634, %633 : vector<8x32xf32>
    %636 = vector.extract_strided_slice %612 {offsets = [0, 64], sizes = [8, 32], strides = [1, 1]} : vector<8x128xf32> to vector<8x32xf32>
    %637 = math.tanh %636 : vector<8x32xf32>
    %638 = vector.extract_strided_slice %612 {offsets = [0, 96], sizes = [8, 32], strides = [1, 1]} : vector<8x128xf32> to vector<8x32xf32>
    %cst_258 = arith.constant 0.000000e+00 : f32
    %639 = vector.broadcast %cst_258 : f32 to vector<8x32xf32>
    %640 = arith.subf %639, %638 : vector<8x32xf32>
    %641 = math.exp %640 : vector<8x32xf32>
    %cst_259 = arith.constant 1.000000e+00 : f32
    %642 = vector.broadcast %cst_259 : f32 to vector<8x32xf32>
    %643 = arith.addf %642, %641 : vector<8x32xf32>
    %cst_260 = arith.constant 1.000000e+00 : f32
    %644 = vector.broadcast %cst_260 : f32 to vector<8x32xf32>
    %645 = arith.divf %644, %643 : vector<8x32xf32>
    %646 = arith.mulf %635, %563 : vector<8x32xf32>
    %647 = arith.mulf %627, %637 : vector<8x32xf32>
    %648 = arith.addf %646, %647 : vector<8x32xf32>
    %649 = math.tanh %648 : vector<8x32xf32>
    %650 = arith.mulf %645, %649 : vector<8x32xf32>
    %651 = vector.extract_strided_slice %619 {offsets = [0, 0], sizes = [8, 32], strides = [1, 1]} : vector<8x128xf32> to vector<8x32xf32>
    %cst_261 = arith.constant 0.000000e+00 : f32
    %652 = vector.broadcast %cst_261 : f32 to vector<8x32xf32>
    %653 = arith.subf %652, %651 : vector<8x32xf32>
    %654 = math.exp %653 : vector<8x32xf32>
    %cst_262 = arith.constant 1.000000e+00 : f32
    %655 = vector.broadcast %cst_262 : f32 to vector<8x32xf32>
    %656 = arith.addf %655, %654 : vector<8x32xf32>
    %cst_263 = arith.constant 1.000000e+00 : f32
    %657 = vector.broadcast %cst_263 : f32 to vector<8x32xf32>
    %658 = arith.divf %657, %656 : vector<8x32xf32>
    %659 = vector.extract_strided_slice %619 {offsets = [0, 32], sizes = [8, 32], strides = [1, 1]} : vector<8x128xf32> to vector<8x32xf32>
    %cst_264 = arith.constant 0.000000e+00 : f32
    %660 = vector.broadcast %cst_264 : f32 to vector<8x32xf32>
    %661 = arith.subf %660, %659 : vector<8x32xf32>
    %662 = math.exp %661 : vector<8x32xf32>
    %cst_265 = arith.constant 1.000000e+00 : f32
    %663 = vector.broadcast %cst_265 : f32 to vector<8x32xf32>
    %664 = arith.addf %663, %662 : vector<8x32xf32>
    %cst_266 = arith.constant 1.000000e+00 : f32
    %665 = vector.broadcast %cst_266 : f32 to vector<8x32xf32>
    %666 = arith.divf %665, %664 : vector<8x32xf32>
    %667 = vector.extract_strided_slice %619 {offsets = [0, 64], sizes = [8, 32], strides = [1, 1]} : vector<8x128xf32> to vector<8x32xf32>
    %668 = math.tanh %667 : vector<8x32xf32>
    %669 = vector.extract_strided_slice %619 {offsets = [0, 96], sizes = [8, 32], strides = [1, 1]} : vector<8x128xf32> to vector<8x32xf32>
    %cst_267 = arith.constant 0.000000e+00 : f32
    %670 = vector.broadcast %cst_267 : f32 to vector<8x32xf32>
    %671 = arith.subf %670, %669 : vector<8x32xf32>
    %672 = math.exp %671 : vector<8x32xf32>
    %cst_268 = arith.constant 1.000000e+00 : f32
    %673 = vector.broadcast %cst_268 : f32 to vector<8x32xf32>
    %674 = arith.addf %673, %672 : vector<8x32xf32>
    %cst_269 = arith.constant 1.000000e+00 : f32
    %675 = vector.broadcast %cst_269 : f32 to vector<8x32xf32>
    %676 = arith.divf %675, %674 : vector<8x32xf32>
    %677 = arith.mulf %666, %594 : vector<8x32xf32>
    %678 = arith.mulf %658, %668 : vector<8x32xf32>
    %679 = arith.addf %677, %678 : vector<8x32xf32>
    %680 = math.tanh %679 : vector<8x32xf32>
    %681 = arith.mulf %676, %680 : vector<8x32xf32>
    %682 = arith.index_cast %c7_i32_240 : i32 to index
    %c0_270 = arith.constant 0 : index
    %c0_271 = arith.constant 0 : index
    %683 = vector.load %arg6[%682, %c0_270, %c0_271] : memref<8x8x32xf32, #tpu.memory_space<vmem>>, vector<1x8x32xf32>
    %684 = vector.shape_cast %683 : vector<1x8x32xf32> to vector<8x32xf32>
    %685 = vector.shape_cast %650 : vector<8x32xf32> to vector<1x8x32xf32>
    tpu.vector_store %arg6[%682, %c0_270, %c0_271], %685 {strides = array<i32>} : memref<8x8x32xf32, #tpu.memory_space<vmem>>, vector<1x8x32xf32>,
    %686 = arith.index_cast %605 : i32 to index
    %c0_272 = arith.constant 0 : index
    %c0_273 = arith.constant 0 : index
    %687 = vector.load %arg7[%686, %c0_272, %c0_273] : memref<8x8x32xf32, #tpu.memory_space<vmem>>, vector<1x8x32xf32>
    %688 = vector.shape_cast %687 : vector<1x8x32xf32> to vector<8x32xf32>
    %689 = vector.shape_cast %681 : vector<8x32xf32> to vector<1x8x32xf32>
    tpu.vector_store %arg7[%686, %c0_272, %c0_273], %689 {strides = array<i32>} : memref<8x8x32xf32, #tpu.memory_space<vmem>>, vector<1x8x32xf32>,
    %c8_i32 = arith.constant 8 : i32
    return
  }
  func.func @transform_0(%arg0: i32) -> (i32, i32, i32) {
    %c0_i32 = arith.constant 0 : i32
    %c0_i32_0 = arith.constant 0 : i32
    %c0_i32_1 = arith.constant 0 : i32
    return %c0_i32, %arg0, %c0_i32_0 : i32, i32, i32
  }
  func.func @transform_1(%arg0: i32) -> (i32, i32) {
    %c0_i32 = arith.constant 0 : i32
    %c0_i32_0 = arith.constant 0 : i32
    %c0_i32_1 = arith.constant 0 : i32
    return %c0_i32, %c0_i32_0 : i32, i32
  }
  func.func @transform_2(%arg0: i32) -> (i32, i32) {
    %c0_i32 = arith.constant 0 : i32
    %c0_i32_0 = arith.constant 0 : i32
    %c0_i32_1 = arith.constant 0 : i32
    return %c0_i32, %c0_i32_0 : i32, i32
  }
  func.func @transform_3(%arg0: i32) -> (i32, i32) {
    %c0_i32 = arith.constant 0 : i32
    %c0_i32_0 = arith.constant 0 : i32
    %c0_i32_1 = arith.constant 0 : i32
    return %c0_i32, %c0_i32_0 : i32, i32
  }
  func.func @transform_4(%arg0: i32) -> (i32, i32) {
    %c0_i32 = arith.constant 0 : i32
    %c0_i32_0 = arith.constant 0 : i32
    %c0_i32_1 = arith.constant 0 : i32
    return %c0_i32, %c0_i32_0 : i32, i32
  }
  func.func @transform_5(%arg0: i32) -> (i32, i32, i32) {
    %c0_i32 = arith.constant 0 : i32
    %c0_i32_0 = arith.constant 0 : i32
    %c0_i32_1 = arith.constant 0 : i32
    return %c0_i32, %arg0, %c0_i32_0 : i32, i32, i32
  }
  func.func @transform_6(%arg0: i32) -> (i32, i32, i32) {
    %c0_i32 = arith.constant 0 : i32
    %c0_i32_0 = arith.constant 0 : i32
    %c0_i32_1 = arith.constant 0 : i32
    return %c0_i32, %arg0, %c0_i32_0 : i32, i32, i32
  }
}

</mosaic_0001>

<bundles_post_ra>
// kernel: tpu_custom_call.1
= control target key start
LH: loop header
LB: loop body
LE: loop exit
PB: predicated region body
PF: predicated region fallthrough
CT: control target
= control target key end

     0   :  { %12 = vsyncpa [#allocation4], 0  ;;  %s3160_s0 = inlined_call_operand.hbm [shape: f32[8,8,32], index: 0, kind: input, shape index: {}]   ;;  %s3161_s1 = inlined_call_operand.hbm [shape: f32[32,256], index: 1, kind: input, shape index: {}]   ;;  %s3162_s2 = inlined_call_operand.vmem [shape: f32[1,256], index: 2, kind: input, shape index: {}]   ;;  %s3163_s3 = inlined_call_operand.hbm [shape: f32[32,128], index: 3, kind: input, shape index: {}]   ;;  %s3164_s4 = inlined_call_operand.hbm [shape: f32[32,128], index: 4, kind: input, shape index: {}]   ;;  %s3165_s5 = inlined_call_operand.hbm [shape: f32[8,8,32], index: 5, kind: output, shape index: {0}]   ;;  %s3166_s6 = inlined_call_operand.hbm [shape: f32[8,8,32], index: 6, kind: output, shape index: {1}]  }
   0x1   :  { %13 = vsyncpa [#allocation7], 0 }
   0x2   :  { %14 = vsyncpa [#allocation10], 0 }
   0x3   :  { %15 = vsyncpa [#allocation5], 0 }
   0x4   :  { %16 = vsyncpa [#allocation13], 0  ;;  %s2711_s21 = smov [#allocation6]   ;;  %s2569_s25 = scalar_lea.hbm %s3161_s1, 1024 }
   0x5   :  { %s34_s22 = sshll.u32 %s2711_s21, 4  ;;  %p2570_p0 = scmp.ne.s32.totalorder %s3161_s1, %s2569_s25  ;;  %s35_s22 = int_to_ptr.vmem [resolvable:$true] %s34_s22 }
   0x6   :  { %p2573_p1 = scmp.lt.u32.totalorder %s2569_s25, %s3161_s1 }
   0x8   :  { %p2575_p2 = pnand %p2573_p1, %p2570_p0 }
   0xa   :  { %2578 = shalt.err (!%p2575_p2)
}
   0xb   :  { %s2579_s30 = scalar_lea.vmem %s35_s22, 1024  ;;  %p2584_p4 = scmp.lt.s32.totalorder %s35_s22, %s35_s22 }
   0xc   :  { %p2580_p3 = scmp.ne.s32.totalorder %s35_s22, %s2579_s30  ;;  %p2585_p5 = scmp.lt.s32.totalorder %s2579_s30, %s2579_s30 }
   0xe   :  { %p2586_p6 = por %p2585_p5, %p2584_p4 }
  0x10   :  { %p2587_p7 = pnand %p2586_p6, %p2580_p3 }
  0x12   :  { %2590 = shalt.err (!%p2587_p7)
}
  0x13   :  { %s2712_s7 = smov 256   ;;  %s2713_s8 = smov 16  }
  0x14   :  { %40 = dma.hbm_to_vmem [thread:$0]  %s3161_s1, 1024, %s35_s22, [#allocation7], %s2712_s7, %s2712_s7, %s2713_s8  }
  0x15   :  { %s2714_s11 = smov [#allocation3]   ;;  %s2591_s15 = scalar_lea.hbm %s3160_s0, 1024 }
  0x16   :  { %s22_s12 = sshll.u32 %s2714_s11, 4  ;;  %p2592_p8 = scmp.ne.s32.totalorder %s3160_s0, %s2591_s15  ;;  %s23_s12 = int_to_ptr.vmem [resolvable:$true] %s22_s12 }
  0x17   :  { %p2595_p9 = scmp.lt.u32.totalorder %s2591_s15, %s3160_s0 }
  0x19   :  { %p2597_p10 = pnand %p2595_p9, %p2592_p8 }
  0x1b   :  { %2600 = shalt.err (!%p2597_p10)
}
  0x1c   :  { %s2601_s20 = scalar_lea.vmem %s23_s12, 1024  ;;  %p2606_p12 = scmp.lt.s32.totalorder %s23_s12, %s23_s12 }
  0x1d   :  { %p2602_p11 = scmp.ne.s32.totalorder %s23_s12, %s2601_s20  ;;  %p2607_p13 = scmp.lt.s32.totalorder %s2601_s20, %s2601_s20 }
  0x1f   :  { %p2608_p0 = por %p2607_p13, %p2606_p12 }
  0x21   :  { %p2609_p1 = pnand %p2608_p0, %p2602_p11 }
  0x23   :  { %2612 = shalt.err (!%p2609_p1)
}
  0x24   :  { %s2715_s1 = smov 128   ;;  %s2716_s21 = smov 8  }
  0x25   :  { %28 = dma.hbm_to_vmem [thread:$0]  %s3160_s0, 1024, %s23_s12, [#allocation4], %s2715_s1, %s2715_s1, %s2716_s21  }
  0x26   :  { %s2717_s24 = smov [#allocation8]   ;;  %s2718_s26 = smov [#allocation9]  }
  0x27   :  { %s48_s25 = sshll.u32 %s2717_s24, 4  ;;  %s60_s27 = sshll.u32 %s2718_s26, 4  ;;  %s49_s25 = int_to_ptr.vmem [resolvable:$true] %s48_s25  ;;  %s2788_s27 = int_to_ptr.vmem [resolvable:$true] %s60_s27 }
  0x28   :  { %s2613_s30 = scalar_lea.hbm %s3163_s3, 512 }
  0x29   :  { %p2614_p2 = scmp.ne.s32.totalorder %s3163_s3, %s2613_s30  ;;  %p2617_p3 = scmp.lt.u32.totalorder %s2613_s30, %s3163_s3 }
  0x2b   :  { %p2619_p4 = pnand %p2617_p3, %p2614_p2 }
  0x2d   :  { %2622 = shalt.err (!%p2619_p4)
}
  0x2e   :  { %s2623_s0 = scalar_lea.vmem %s49_s25, 512  ;;  %p2628_p6 = scmp.lt.s32.totalorder %s49_s25, %s49_s25 }
  0x2f   :  { %p2624_p5 = scmp.ne.s32.totalorder %s49_s25, %s2623_s0  ;;  %p2629_p7 = scmp.lt.s32.totalorder %s2623_s0, %s2623_s0 }
  0x31   :  { %p2630_p8 = por %p2629_p7, %p2628_p6 }
  0x33   :  { %p2631_p9 = pnand %p2630_p8, %p2624_p5 }
  0x35   :  { %2634 = shalt.err (!%p2631_p9)
}
  0x36   :  { %54 = dma.hbm_to_vmem [thread:$0]  %s3163_s3, 512, %s49_s25, [#allocation7], %s2715_s1, %s2715_s1, %s2716_s21  }
  0x37   :  { %s2635_s15 = scalar_lea.hbm %s3164_s4, 512 }
  0x38   :  { %p2636_p10 = scmp.ne.s32.totalorder %s3164_s4, %s2635_s15  ;;  %p2639_p11 = scmp.lt.u32.totalorder %s2635_s15, %s3164_s4 }
  0x3a   :  { %p2641_p12 = pnand %p2639_p11, %p2636_p10 }
  0x3c   :  { %2644 = shalt.err (!%p2641_p12)
}
  0x3d   :  { %s2645_s20 = scalar_lea.vmem %s2788_s27, 512  ;;  %p2650_p0 = scmp.lt.s32.totalorder %s2788_s27, %s2788_s27 }
  0x3e   :  { %p2646_p13 = scmp.ne.s32.totalorder %s2788_s27, %s2645_s20  ;;  %p2651_p1 = scmp.lt.s32.totalorder %s2645_s20, %s2645_s20 }
  0x40   :  { %p2652_p2 = por %p2651_p1, %p2650_p0 }
  0x42   :  { %p2653_p3 = pnand %p2652_p2, %p2646_p13 }
  0x44   :  { %2656 = shalt.err (!%p2653_p3)
}
  0x45   :  { %66 = dma.hbm_to_vmem [thread:$0]  %s3164_s4, 512, %s2788_s27, [#allocation10], %s2715_s1, %s2715_s1, %s2716_s21  }
  0x46   :  { %2701 = dma.done.wait [#allocation4], 1024  }
  0x47   :  { %2702 = vsyncadd [#allocation4], 4294966272 }
  0x48   :  { %2703 = dma.done.wait [#allocation7], 1536  }
  0x49   :  { %2704 = vsyncadd [#allocation7], 4294965760 }
  0x4a   :  { %2705 = dma.done.wait [#allocation10], 512  }
  0x4b   :  { %2706 = vsyncadd [#allocation10], 4294966784  ;;  %v2719_v0 = vmov 0.0|0.0   ;;  %v2720_v1 = vmov 0.0   ;;  %vm2721_vm0 = vmmov 0   ;;  %v89_v2 = vld [vmem:[#allocation6 + $0x8] sm:$0xff]  ;;  %v235_v34 = vlaneseq }
  0x4c   :  { %2330 = vmatprep.subr.bf16.mxu1 %v2719_v0  ;;  %185 = vmatprep.mubr.f32.mxu0 %v2720_v1  ;;  %v91_v3 = vld [vmem:[#allocation6 + $0x18] sm:$0xff]  ;;  %v88_v4 = vld [vmem:[#allocation6] sm:$0xff]  ;;  %v90_v6 = vld [vmem:[#allocation6 + $0x10] sm:$0xff]  ;;  %vm96_vm1 = vcmask 261120   ;;  %s2723_s24 = smov 32   ;;  %s2724_s25 = smov [#allocation11]  }
  0x4d   :  { %2154 = vmatprep.mubr.msk.f32.mxu1 %vm2721_vm0, %v2720_v1  ;;  %v2322_v5 = vpack.c.bf16 %v91_v3, %v89_v2  ;;  %v278_v7 = vld [vmem:[#allocation8] sm:$0xff]  ;;  %v279_v8 = vld [vmem:[#allocation8 + $0x8] sm:$0xff]  ;;  %v2324_v9 = vpack.c.bf16 %v90_v6, %v88_v4  ;;  %v95_v12 = vld [vmem:[#allocation6 + $0x38] sm:$0xff]  ;;  %v236_v35 = vshrl.u32 %v235_v34, 7  ;;  %s2014_s26 = sshll.u32 %s2724_s25, 4  ;;  %s2015_s26 = int_to_ptr.vmem [resolvable:$true] %s2014_s26 }
  0x4e   :  { %v2829_v10 = vpack.c.bf16 %v279_v8, %v278_v7  ;;  %v93_v11 = vld [vmem:[#allocation6 + $0x28] sm:$0xff]  ;;  %v92_v13 = vld [vmem:[#allocation6 + $0x20] sm:$0xff]  ;;  %v94_v15 = vld [vmem:[#allocation6 + $0x30] sm:$0xff]  ;;  %s2657_s27 = scalar_lea.vmem %s2015_s26, 1024  ;;  %p2662_p5 = scmp.lt.s32.totalorder %s2015_s26, %s2015_s26 }
  0x4f   :  { %2323 = vmatprep.subr.bf16.mxu0 %v2322_v5  ;;  %v2326_v14 = vpack.c.bf16 %v95_v12, %v93_v11  ;;  %v280_v16 = vld [vmem:[#allocation8 + $0x10] sm:$0xff]  ;;  %v281_v17 = vld [vmem:[#allocation8 + $0x18] sm:$0xff]  ;;  %v2328_v18 = vpack.c.bf16 %v94_v15, %v92_v13  ;;  %v358_v20 = vld [vmem:[#allocation9] sm:$0xff]  ;;  %v237_v36 = vsub.s32 0, %v236_v35  ;;  %v241_v38 = vsub.s32 1, %v236_v35  ;;  %p2658_p4 = scmp.ne.s32.totalorder %s2015_s26, %s2657_s27  ;;  %p2663_p6 = scmp.lt.s32.totalorder %s2657_s27, %s2657_s27 }
  0x50   :  { %2325 = vmatpush1.bf16.msra.mxu0 %v2324_v9  ;;  %2332 = vmatpush3.bf16.msra.mxu1 %v2829_v10  ;;  %v2832_v19 = vpack.c.bf16 %v281_v17, %v280_v16  ;;  %v359_v21 = vld [vmem:[#allocation9 + $0x8] sm:$0xff]  ;;  %v80_v22 = vld [vmem:[#allocation3] sm:$0xff]  ;;  %v360_v24 = vld [vmem:[#allocation9 + $0x10] sm:$0xff] }
  0x51   :  { %2327 = vmatprep.subr.bf16.mxu0 %v2326_v14  ;;  %2333 = vmatprep.subr.bf16.mxu1 %v2719_v0  ;;  %v2836_v23 = vpack.c.bf16 %v359_v21, %v358_v20  ;;  %v361_v25 = vld [vmem:[#allocation9 + $0x18] sm:$0xff]  ;;  %v81_v26 = vld [vmem:[#allocation3 + $0x8] sm:$0xff]  ;;  %v82_v28 = vld [vmem:[#allocation3 + $0x10] sm:$0xff]  ;;  %p2664_p7 = por %p2663_p6, %p2662_p5 }
  0x52   :  { %v2844_v27 = vpack.c.bf16 %v361_v25, %v360_v24  ;;  %v83_v29 = vld [vmem:[#allocation3 + $0x18] sm:$0xff]  ;;  %v84_v30 = vld [vmem:[#allocation3 + $0x20] sm:$0xff]  ;;  %v85_v31 = vld [vmem:[#allocation3 + $0x28] sm:$0xff] }
  0x53   :  { %v86_v32 = vld [vmem:[#allocation3 + $0x30] sm:$0xff]  ;;  %v87_v33 = vld [vmem:[#allocation3 + $0x38] sm:$0xff]  ;;  %v79_v37 = vld [vmem:[%s3162_s2] sm:$0x3]  ;;  %s2722_s2 = smov 64   ;;  %p2665_p8 = pnand %p2664_p7, %p2658_p4 }
  0x54   :  { %2329 = vmatpush1.bf16.msra.mxu0 %v2328_v18  ;;  %2335 = vmatpush3.bf16.msra.mxu1 %v2832_v19  ;;  %v238_v39 = vrot.slane %v79_v37, %v237_v36  ;;  %v242_v40 = vrot.slane %v79_v37, %v241_v38 }
  0x55   :  { %2336 = vmatprep.subr.bf16.mxu1 %v2719_v0  ;;  %2354 = vmatprep.subr.bf16.mxu0 %v2719_v0 }
  0x57   :  { %2044 = vmatmul.mubr.msk.f32.vlgmr.msra.gmra.mrb[0].mxu0 %vm96_vm1, %v80_v22  ;;  %2155 = vmatmul.mubr.f32.vlgmr.msra.gmra.mrb[0].mxu1 %v2720_v1 }
  0x58   :  { %191 = vmatprep.mubr.f32.mxu0 %v2720_v1  ;;  %2338 = vmatpush3.bf16.msra.mxu1 %v2836_v23 }
  0x59   :  { %2339 = vmatprep.subr.bf16.mxu1 %v2719_v0  ;;  %2165 = vmatprep.mubr.msk.f32.mxu1 %vm2721_vm0, %v2720_v1 }
  0x5a   :  { %2356 = vmatpush3.bf16.msra.mxu0 %v2829_v10 }
  0x5b   :  { %2045 = vmatmul.mubr.msk.f32.gmra.mrb[2].mxu0 %vm96_vm1, %v81_v26  ;;  %2357 = vmatprep.subr.bf16.mxu0 %v2719_v0 }
  0x5c   :  { %197 = vmatprep.mubr.f32.mxu0 %v2720_v1  ;;  %2341 = vmatpush3.bf16.msra.mxu1 %v2844_v27 }
  0x5d   :  { %2342 = vmatprep.subr.bf16.mxu1 %v2719_v0 }
  0x5e   :  { %2359 = vmatpush3.bf16.msra.mxu0 %v2832_v19 }
  0x5f   :  { %2046 = vmatmul.mubr.msk.f32.gmra.mrb[4].mxu0 %vm96_vm1, %v82_v28  ;;  %2166 = vmatmul.mubr.f32.vlgmr.msra.gmra.mrb[2].mxu1 %v2720_v1 }
  0x60   :  { %203 = vmatprep.mubr.f32.mxu0 %v2720_v1  ;;  %2344 = vmatpush3.bf16.msra.mxu1 %v2829_v10 }
  0x61   :  { %2345 = vmatprep.subr.bf16.mxu1 %v2719_v0  ;;  %2176 = vmatprep.mubr.msk.f32.mxu1 %vm2721_vm0, %v2720_v1 }
  0x62   :  { %2366 = vmatprep.subr.bf16.mxu0 %v2719_v0 }
  0x63   :  { %2047 = vmatmul.mubr.msk.f32.gmra.mrb[6].mxu0 %vm96_vm1, %v83_v29 }
  0x64   :  { %209 = vmatprep.mubr.f32.mxu0 %v2720_v1  ;;  %2347 = vmatpush3.bf16.msra.mxu1 %v2832_v19 }
  0x65   :  { %2348 = vmatprep.subr.bf16.mxu1 %v2719_v0 }
  0x67   :  { %2048 = vmatmul.mubr.msk.f32.gmra.mrb[8].mxu0 %vm96_vm1, %v84_v30 }
  0x68   :  { %215 = vmatprep.mubr.f32.mxu0 %v2720_v1 }
  0x6b   :  { %2049 = vmatmul.mubr.msk.f32.gmra.mrb[10].mxu0 %vm96_vm1, %v85_v31 }
  0x6c   :  { %221 = vmatprep.mubr.f32.mxu0 %v2720_v1 }
  0x6f   :  { %2050 = vmatmul.mubr.msk.f32.gmra.mrb[12].mxu0 %vm96_vm1, %v86_v32 }
  0x70   :  { %227 = vmatprep.mubr.f32.mxu0 %v2720_v1 }
  0x73   :  { %2051 = vmatmul.mubr.msk.f32.gmra.mrb[14].mxu0 %vm96_vm1, %v87_v33 }
  0x74   :  { %2198 = vmatprep.mubr.msk.f32.mxu0 %vm2721_vm0, %v2720_v1 }
 0x12a   :  { %v187_v41 = vpop.f32.mrb[0].mxu0  ;;  %v351_v42 = vpop.f32.mrb[0].mxu1 }
 0x12b   :  { %v245_v43 = vadd.f32 %v238_v39, %v187_v41  ;;  %v189_v44 = vpop.f32.mrb[1].mxu0  ;;  %v2156_v45 = vpop.f32.mrb[1].mxu1 }
 0x12c   :  { %v2880_v46 = vadd.f32 %v242_v40, %v189_v44 }
 0x12d   :  { %v355_v47 = vadd.f32 %v351_v42, %v245_v43 }
 0x12e   :  { %v193_v48 = vpop.f32.mrb[2].mxu0 }
 0x12f   :  { %2441 = vtanh.f32 %v355_v47  ;;  %v2882_v49 = vadd.f32 %v238_v39, %v193_v48  ;;  %v195_v50 = vpop.f32.mrb[3].mxu0  ;;  %v433_v21 = vsub.f32 0.0, %v355_v47 }
 0x130   :  { %v2884_v51 = vadd.f32 %v242_v40, %v195_v50 }
 0x131   :  { %v434_v22 = vmul.f32 1.442695, %v433_v21 }
 0x132   :  { %v199_v52 = vpop.f32.mrb[4].mxu0  ;;  %v428_v53 = vpop.f32.mrb[2].mxu1 }
 0x133   :  { %v2886_v54 = vadd.f32 %v238_v39, %v199_v52  ;;  %v201_v55 = vpop.f32.mrb[5].mxu0  ;;  %v2167_v56 = vpop.f32.mrb[3].mxu1 }
 0x134   :  { %v2888_v57 = vadd.f32 %v242_v40, %v201_v55 }
 0x136   :  { %v205_v58 = vpop.f32.mrb[6].mxu0 }
 0x137   :  { %v2890_v59 = vadd.f32 %v238_v39, %v205_v58  ;;  %v207_v60 = vpop.f32.mrb[7].mxu0 }
 0x138   :  { %v2892_v61 = vadd.f32 %v242_v40, %v207_v60 }
 0x139   :  { %v2442_v62 = vpop.eup %2441 }
 0x13a   :  { %v211_v63 = vpop.f32.mrb[8].mxu0  ;;  %442 = vrot.lane.b32.xlu0 %v2442_v62, %s2722_s2 }
 0x13b   :  { %v2895_v2 = vadd.f32 %v238_v39, %v211_v63  ;;  %v213_v3 = vpop.f32.mrb[9].mxu0 }
 0x13c   :  { %v2897_v4 = vadd.f32 %v242_v40, %v213_v3 }
 0x13e   :  { %v217_v5 = vpop.f32.mrb[10].mxu0 }
 0x13f   :  { %v2899_v6 = vadd.f32 %v238_v39, %v217_v5  ;;  %v219_v7 = vpop.f32.mrb[11].mxu0 }
 0x140   :  { %v2901_v8 = vadd.f32 %v242_v40, %v219_v7 }
 0x142   :  { %v223_v9 = vpop.f32.mrb[12].mxu0 }
 0x143   :  { %v2903_v11 = vadd.f32 %v238_v39, %v223_v9  ;;  %v225_v12 = vpop.f32.mrb[13].mxu0 }
 0x144   :  { %v2905_v13 = vadd.f32 %v242_v40, %v225_v12 }
 0x146   :  { %v229_v14 = vpop.f32.mrb[14].mxu0 }
 0x147   :  { %v2907_v15 = vadd.f32 %v238_v39, %v229_v14  ;;  %v231_v16 = vpop.f32.mrb[15].mxu0 }
 0x148   :  { %v260_v17 = vadd.f32 %v242_v40, %v231_v16 }
 0x14a   :  { %v432_v18 = vadd.f32 %v428_v53, %v260_v17 }
 0x14c   :  { %2443 = vtanh.f32 %v432_v18  ;;  %v457_v26 = vsub.f32 0.0, %v432_v18 }
 0x14d   :  { %2445 = vpow2.f32 %v434_v22 }
 0x14e   :  { %v458_v28 = vmul.f32 1.442695, %v457_v26 }
 0x156   :  { %v2444_v20 = vpop.eup %2443 }
 0x157   :  { %466 = vrot.lane.b32.xlu0 %v2444_v20, %s2722_s2  ;;  %v2446_v24 = vpop.eup %2445 }
 0x158   :  { %v436_v25 = vadd.f32 1.0, %v2446_v24 }
 0x15a   :  { %2447 = vrcp.f32 %v436_v25 }
 0x15b   :  { %2449 = vpow2.f32 %v458_v28 }
 0x164   :  { %v2448_v29 = vpop.eup %2447 }
 0x165   :  { %v2450_v32 = vpop.eup %2449  ;;  %v440_v37 = vmul.f32 0.0, %v2448_v29 }
 0x166   :  { %v460_v33 = vadd.f32 1.0, %v2450_v32 }
 0x168   :  { %2451 = vrcp.f32 %v460_v33 }
 0x172   :  { %v2452_v34 = vpop.eup %2451 }
 0x173   :  { %v464_v41 = vmul.f32 0.0, %v2452_v34 }
 0x1ac   :  { %v443_v30 = vpop.permute.xlu0 %442 }
 0x1ad   :  { %v445_v31 = vmul.f32 %v2448_v29, %v443_v30 }
 0x1af   :  { %447 = vrot.lane.b32.xlu1 %v445_v31, %s2723_s24 }
 0x1c9   :  { %v467_v35 = vpop.permute.xlu0 %466 }
 0x1ca   :  { %v469_v36 = vmul.f32 %v2452_v34, %v467_v35 }
 0x1cc   :  { %471 = vrot.lane.b32.xlu1 %v469_v36, %s2723_s24 }
 0x221   :  { %v448_v38 = vpop.permute.xlu1 %447 }
 0x222   :  { %v2912_v39 = vadd.f32 %v448_v38, %v440_v37 }
 0x224   :  { %2453 = vtanh.f32 %v2912_v39 }
 0x22e   :  { %v2454_v40 = vpop.eup %2453 }
 0x22f   :  { %453 = vrot.lane.b32.xlu0 %v2454_v40, %s2722_s2 }
 0x23e   :  { %v472_v42 = vpop.permute.xlu1 %471 }
 0x23f   :  { %v2916_v43 = vadd.f32 %v472_v42, %v464_v41 }
 0x241   :  { %2455 = vtanh.f32 %v2916_v43 }
 0x24b   :  { %v2456_v44 = vpop.eup %2455 }
 0x24c   :  { %477 = vrot.lane.b32.xlu1 %v2456_v44, %s2722_s2 }
 0x2a1   :  { %v454_v45 = vpop.permute.xlu0 %453 }
 0x2a2   :  { %v456_v47 = vmul.f32 %v2448_v29, %v454_v45 }
 0x2a4   :  { %482 = vrot.lane.b32.xlu0 %v456_v47, %s2723_s24 }
 0x2be   :  { %v478_v48 = vpop.permute.xlu1 %477 }
 0x2bf   :  { %v480_v50 = vmul.f32 %v2452_v34, %v478_v48 }
 0x2c1   :  { %487 = vrot.lane.b32.xlu1 %v480_v50, %s2723_s24 }
 0x316   :  { %v483_v52 = vpop.permute.xlu0 %482 }
 0x317   :  { %485 = vst.msk [vmem:[#allocation11] sm:$0xff] %vm96_vm1, %v483_v52  ;;  %2177 = vmatmul.mubr.msk.f32.vlgmr.msra.gmra.mrb[4].mxu1 %vm96_vm1, %v483_v52 }
 0x318   :  { %2350 = vmatpush3.bf16.msra.mxu1 %v2836_v23  ;;  %2187 = vmatprep.mubr.msk.f32.mxu1 %vm2721_vm0, %v2720_v1 }
 0x319   :  { %2351 = vmatprep.subr.bf16.mxu1 %v2719_v0 }
 0x31c   :  { %2353 = vmatpush3.bf16.msra.mxu1 %v2844_v27 }
 0x31d   :  { %2360 = vmatprep.subr.bf16.mxu1 %v2719_v0 }
 0x333   :  { %v488_v53 = vpop.permute.xlu1 %487 }
 0x334   :  { %491 = vst.msk [vmem:[#allocation12 + $0x38] sm:$0xff] %vm96_vm1, %v488_v53  ;;  %2188 = vmatmul.mubr.msk.f32.vlgmr.msra.gmra.mrb[6].mxu1 %vm96_vm1, %v488_v53 }
 0x335   :  { %2362 = vmatpush3.bf16.msra.mxu1 %v2836_v23  ;;  %2209 = vmatprep.mubr.msk.f32.mxu1 %vm2721_vm0, %v2720_v1 }
 0x336   :  { %2363 = vmatprep.subr.bf16.mxu1 %v2719_v0 }
 0x339   :  { %2365 = vmatpush3.bf16.msra.mxu1 %v2844_v27 }
 0x33a   :  { %2372 = vmatprep.subr.bf16.mxu1 %v2719_v0 }
 0x3ea   :  { %v566_v55 = vpop.f32.mrb[4].mxu1 }
 0x3eb   :  { %v570_v56 = vadd.f32 %v566_v55, %v2882_v49  ;;  %v2178_v58 = vpop.f32.mrb[5].mxu1 }
 0x3ed   :  { %2457 = vtanh.f32 %v570_v56  ;;  %v650_v7 = vsub.f32 0.0, %v570_v56 }
 0x3ef   :  { %v651_v9 = vmul.f32 1.442695, %v650_v7 }
 0x3f7   :  { %v2458_v60 = vpop.eup %2457 }
 0x3f8   :  { %659 = vrot.lane.b32.xlu0 %v2458_v60, %s2722_s2 }
 0x407   :  { %v645_v62 = vpop.f32.mrb[6].mxu1 }
 0x408   :  { %v649_v63 = vadd.f32 %v645_v62, %v2905_v13  ;;  %v2189_v3 = vpop.f32.mrb[7].mxu1 }
 0x40a   :  { %2459 = vtanh.f32 %v649_v63  ;;  %v674_v49 = vsub.f32 0.0, %v649_v63 }
 0x40b   :  { %2461 = vpow2.f32 %v651_v9 }
 0x40c   :  { %v675_v16 = vmul.f32 1.442695, %v674_v49 }
 0x414   :  { %v2460_v5 = vpop.eup %2459 }
 0x415   :  { %683 = vrot.lane.b32.xlu1 %v2460_v5, %s2722_s2  ;;  %v2462_v12 = vpop.eup %2461 }
 0x416   :  { %v653_v14 = vadd.f32 1.0, %v2462_v12 }
 0x418   :  { %2463 = vrcp.f32 %v653_v14 }
 0x419   :  { %2465 = vpow2.f32 %v675_v16 }
 0x422   :  { %v2464_v17 = vpop.eup %2463 }
 0x423   :  { %v2466_v13 = vpop.eup %2465  ;;  %v657_v26 = vmul.f32 %v2464_v17, %v2912_v39 }
 0x424   :  { %v677_v21 = vadd.f32 1.0, %v2466_v13 }
 0x426   :  { %2467 = vrcp.f32 %v677_v21 }
 0x430   :  { %v2468_v22 = vpop.eup %2467 }
 0x431   :  { %v681_v31 = vmul.f32 %v2468_v22, %v2916_v43 }
 0x46a   :  { %v660_v18 = vpop.permute.xlu0 %659 }
 0x46b   :  { %v662_v20 = vmul.f32 %v2464_v17, %v660_v18 }
 0x46d   :  { %664 = vrot.lane.b32.xlu0 %v662_v20, %s2723_s24 }
 0x487   :  { %v684_v24 = vpop.permute.xlu1 %683 }
 0x488   :  { %v686_v25 = vmul.f32 %v2468_v22, %v684_v24 }
 0x48a   :  { %688 = vrot.lane.b32.xlu1 %v686_v25, %s2723_s24 }
 0x4df   :  { %v665_v28 = vpop.permute.xlu0 %664 }
 0x4e0   :  { %v2945_v29 = vadd.f32 %v665_v28, %v657_v26 }
 0x4e2   :  { %2469 = vtanh.f32 %v2945_v29 }
 0x4ec   :  { %v2470_v30 = vpop.eup %2469 }
 0x4ed   :  { %670 = vrot.lane.b32.xlu0 %v2470_v30, %s2722_s2 }
 0x4fc   :  { %v689_v32 = vpop.permute.xlu1 %688 }
 0x4fd   :  { %v2950_v33 = vadd.f32 %v689_v32, %v681_v31 }
 0x4ff   :  { %2471 = vtanh.f32 %v2950_v33 }
 0x509   :  { %v2472_v34 = vpop.eup %2471 }
 0x50a   :  { %694 = vrot.lane.b32.xlu1 %v2472_v34, %s2722_s2 }
 0x55f   :  { %v671_v35 = vpop.permute.xlu0 %670 }
 0x560   :  { %v673_v36 = vmul.f32 %v2464_v17, %v671_v35 }
 0x562   :  { %699 = vrot.lane.b32.xlu0 %v673_v36, %s2723_s24 }
 0x57c   :  { %v695_v37 = vpop.permute.xlu1 %694 }
 0x57d   :  { %v697_v38 = vmul.f32 %v2468_v22, %v695_v37 }
 0x57f   :  { %705 = vrot.lane.b32.xlu1 %v697_v38, %s2723_s24 }
 0x5d4   :  { %v700_v39 = vpop.permute.xlu0 %699 }
 0x5d5   :  { %703 = vst.msk [vmem:[#allocation11 + $0x8] sm:$0xff] %vm96_vm1, %v700_v39  ;;  %2199 = vmatmul.mubr.msk.f32.vlgmr.msra.gmra.mrb[16].mxu0 %vm96_vm1, %v700_v39 }
 0x5d6   :  { %2368 = vmatpush3.bf16.msra.mxu0 %v2829_v10  ;;  %2220 = vmatprep.mubr.msk.f32.mxu0 %vm2721_vm0, %v2720_v1 }
 0x5d7   :  { %2369 = vmatprep.subr.bf16.mxu0 %v2719_v0 }
 0x5da   :  { %2371 = vmatpush3.bf16.msra.mxu0 %v2832_v19 }
 0x5db   :  { %2378 = vmatprep.subr.bf16.mxu0 %v2719_v0 }
 0x5f1   :  { %v706_v40 = vpop.permute.xlu1 %705 }
 0x5f2   :  { %709 = vst.msk [vmem:[#allocation12 + $0x30] sm:$0xff] %vm96_vm1, %v706_v40  ;;  %2210 = vmatmul.mubr.msk.f32.vlgmr.msra.gmra.mrb[8].mxu1 %vm96_vm1, %v706_v40 }
 0x5f3   :  { %2374 = vmatpush3.bf16.msra.mxu1 %v2836_v23  ;;  %2231 = vmatprep.mubr.msk.f32.mxu1 %vm2721_vm0, %v2720_v1 }
 0x5f4   :  { %2375 = vmatprep.subr.bf16.mxu1 %v2719_v0 }
 0x5f7   :  { %2377 = vmatpush3.bf16.msra.mxu1 %v2844_v27 }
 0x5f8   :  { %2384 = vmatprep.subr.bf16.mxu1 %v2719_v0 }
 0x6a8   :  { %v784_v41 = vpop.f32.mrb[16].mxu0 }
 0x6a9   :  { %v788_v42 = vadd.f32 %v784_v41, %v2886_v54  ;;  %v2200_v43 = vpop.f32.mrb[17].mxu0 }
 0x6ab   :  { %2473 = vtanh.f32 %v788_v42  ;;  %v868_v52 = vsub.f32 0.0, %v788_v42 }
 0x6ad   :  { %v869_v53 = vmul.f32 1.442695, %v868_v52 }
 0x6b5   :  { %v2474_v44 = vpop.eup %2473 }
 0x6b6   :  { %877 = vrot.lane.b32.xlu0 %v2474_v44, %s2722_s2 }
 0x6c5   :  { %v863_v45 = vpop.f32.mrb[8].mxu1 }
 0x6c6   :  { %v867_v47 = vadd.f32 %v863_v45, %v2901_v8  ;;  %v2211_v48 = vpop.f32.mrb[9].mxu1 }
 0x6c8   :  { %2475 = vtanh.f32 %v867_v47  ;;  %v892_v54 = vsub.f32 0.0, %v867_v47 }
 0x6c9   :  { %2477 = vpow2.f32 %v869_v53 }
 0x6ca   :  { %v893_v58 = vmul.f32 1.442695, %v892_v54 }
 0x6d2   :  { %v2476_v50 = vpop.eup %2475 }
 0x6d3   :  { %901 = vrot.lane.b32.xlu1 %v2476_v50, %s2722_s2  ;;  %v2478_v55 = vpop.eup %2477 }
 0x6d4   :  { %v871_v56 = vadd.f32 1.0, %v2478_v55 }
 0x6d6   :  { %2479 = vrcp.f32 %v871_v56 }
 0x6d7   :  { %2481 = vpow2.f32 %v893_v58 }
 0x6e0   :  { %v2480_v60 = vpop.eup %2479 }
 0x6e1   :  { %v2482_v8 = vpop.eup %2481  ;;  %v875_v12 = vmul.f32 %v2480_v60, %v2945_v29 }
 0x6e2   :  { %v895_v3 = vadd.f32 1.0, %v2482_v8 }
 0x6e4   :  { %2483 = vrcp.f32 %v895_v3 }
 0x6ee   :  { %v2484_v5 = vpop.eup %2483 }
 0x6ef   :  { %v899_v17 = vmul.f32 %v2484_v5, %v2950_v33 }
 0x728   :  { %v878_v62 = vpop.permute.xlu0 %877 }
 0x729   :  { %v880_v63 = vmul.f32 %v2480_v60, %v878_v62 }
 0x72b   :  { %882 = vrot.lane.b32.xlu0 %v880_v63, %s2723_s24 }
 0x745   :  { %v902_v7 = vpop.permute.xlu1 %901 }
 0x746   :  { %v904_v9 = vmul.f32 %v2484_v5, %v902_v7 }
 0x748   :  { %906 = vrot.lane.b32.xlu1 %v904_v9, %s2723_s24 }
 0x79d   :  { %v883_v14 = vpop.permute.xlu0 %882 }
 0x79e   :  { %v2979_v49 = vadd.f32 %v883_v14, %v875_v12 }
 0x7a0   :  { %2485 = vtanh.f32 %v2979_v49 }
 0x7aa   :  { %v2486_v16 = vpop.eup %2485 }
 0x7ab   :  { %888 = vrot.lane.b32.xlu0 %v2486_v16, %s2722_s2 }
 0x7ba   :  { %v907_v18 = vpop.permute.xlu1 %906 }
 0x7bb   :  { %v2984_v20 = vadd.f32 %v907_v18, %v899_v17 }
 0x7bd   :  { %2487 = vtanh.f32 %v2984_v20 }
 0x7c7   :  { %v2488_v13 = vpop.eup %2487 }
 0x7c8   :  { %912 = vrot.lane.b32.xlu1 %v2488_v13, %s2722_s2 }
 0x81d   :  { %v889_v21 = vpop.permute.xlu0 %888 }
 0x81e   :  { %v891_v22 = vmul.f32 %v2480_v60, %v889_v21 }
 0x820   :  { %917 = vrot.lane.b32.xlu0 %v891_v22, %s2723_s24 }
 0x83a   :  { %v913_v24 = vpop.permute.xlu1 %912 }
 0x83b   :  { %v915_v25 = vmul.f32 %v2484_v5, %v913_v24 }
 0x83d   :  { %923 = vrot.lane.b32.xlu1 %v915_v25, %s2723_s24 }
 0x892   :  { %v918_v26 = vpop.permute.xlu0 %917 }
 0x893   :  { %921 = vst.msk [vmem:[#allocation11 + $0x10] sm:$0xff] %vm96_vm1, %v918_v26  ;;  %2221 = vmatmul.mubr.msk.f32.vlgmr.msra.gmra.mrb[18].mxu0 %vm96_vm1, %v918_v26 }
 0x894   :  { %2380 = vmatpush3.bf16.msra.mxu0 %v2829_v10  ;;  %2242 = vmatprep.mubr.msk.f32.mxu0 %vm2721_vm0, %v2720_v1 }
 0x895   :  { %2381 = vmatprep.subr.bf16.mxu0 %v2719_v0 }
 0x898   :  { %2383 = vmatpush3.bf16.msra.mxu0 %v2832_v19 }
 0x899   :  { %2390 = vmatprep.subr.bf16.mxu0 %v2719_v0 }
 0x8af   :  { %v924_v28 = vpop.permute.xlu1 %923 }
 0x8b0   :  { %927 = vst.msk [vmem:[#allocation12 + $0x28] sm:$0xff] %vm96_vm1, %v924_v28  ;;  %2232 = vmatmul.mubr.msk.f32.vlgmr.msra.gmra.mrb[10].mxu1 %vm96_vm1, %v924_v28 }
 0x8b1   :  { %2386 = vmatpush3.bf16.msra.mxu1 %v2836_v23  ;;  %2253 = vmatprep.mubr.msk.f32.mxu1 %vm2721_vm0, %v2720_v1 }
 0x8b2   :  { %2387 = vmatprep.subr.bf16.mxu1 %v2719_v0 }
 0x8b5   :  { %2389 = vmatpush3.bf16.msra.mxu1 %v2844_v27 }
 0x8b6   :  { %2396 = vmatprep.subr.bf16.mxu1 %v2719_v0 }
 0x966   :  { %v1002_v29 = vpop.f32.mrb[18].mxu0 }
 0x967   :  { %v1006_v30 = vadd.f32 %v1002_v29, %v2890_v59  ;;  %v2222_v31 = vpop.f32.mrb[19].mxu0 }
 0x969   :  { %2489 = vtanh.f32 %v1006_v30  ;;  %v1086_v37 = vsub.f32 0.0, %v1006_v30 }
 0x96b   :  { %v1087_v38 = vmul.f32 1.442695, %v1086_v37 }
 0x973   :  { %v2490_v32 = vpop.eup %2489 }
 0x974   :  { %1095 = vrot.lane.b32.xlu0 %v2490_v32, %s2722_s2 }
 0x983   :  { %v1081_v33 = vpop.f32.mrb[10].mxu1 }
 0x984   :  { %v1085_v34 = vadd.f32 %v1081_v33, %v2897_v4  ;;  %v2233_v35 = vpop.f32.mrb[11].mxu1 }
 0x986   :  { %2491 = vtanh.f32 %v1085_v34  ;;  %v1110_v59 = vsub.f32 0.0, %v1085_v34 }
 0x987   :  { %2493 = vpow2.f32 %v1087_v38 }
 0x988   :  { %v1111_v41 = vmul.f32 1.442695, %v1110_v59 }
 0x990   :  { %v2492_v36 = vpop.eup %2491 }
 0x991   :  { %1119 = vrot.lane.b32.xlu1 %v2492_v36, %s2722_s2  ;;  %v2494_v39 = vpop.eup %2493 }
 0x992   :  { %v1089_v40 = vadd.f32 1.0, %v2494_v39 }
 0x994   :  { %2495 = vrcp.f32 %v1089_v40 }
 0x995   :  { %2497 = vpow2.f32 %v1111_v41 }
 0x99e   :  { %v2496_v42 = vpop.eup %2495 }
 0x99f   :  { %v2498_v4 = vpop.eup %2497  ;;  %v1093_v52 = vmul.f32 %v2496_v42, %v2979_v49 }
 0x9a0   :  { %v1113_v45 = vadd.f32 1.0, %v2498_v4 }
 0x9a2   :  { %2499 = vrcp.f32 %v1113_v45 }
 0x9ac   :  { %v2500_v47 = vpop.eup %2499 }
 0x9ad   :  { %v1117_v54 = vmul.f32 %v2500_v47, %v2984_v20 }
 0x9e6   :  { %v1096_v43 = vpop.permute.xlu0 %1095 }
 0x9e7   :  { %v1098_v44 = vmul.f32 %v2496_v42, %v1096_v43 }
 0x9e9   :  { %1100 = vrot.lane.b32.xlu0 %v1098_v44, %s2723_s24 }
 0xa03   :  { %v1120_v48 = vpop.permute.xlu1 %1119 }
 0xa04   :  { %v1122_v50 = vmul.f32 %v2500_v47, %v1120_v48 }
 0xa06   :  { %1124 = vrot.lane.b32.xlu1 %v1122_v50, %s2723_s24 }
 0xa5b   :  { %v1101_v53 = vpop.permute.xlu0 %1100 }
 0xa5c   :  { %v3013_v55 = vadd.f32 %v1101_v53, %v1093_v52 }
 0xa5e   :  { %2501 = vtanh.f32 %v3013_v55 }
 0xa68   :  { %v2502_v56 = vpop.eup %2501 }
 0xa69   :  { %1106 = vrot.lane.b32.xlu0 %v2502_v56, %s2722_s2 }
 0xa78   :  { %v1125_v58 = vpop.permute.xlu1 %1124 }
 0xa79   :  { %v3018_v60 = vadd.f32 %v1125_v58, %v1117_v54 }
 0xa7b   :  { %2503 = vtanh.f32 %v3018_v60 }
 0xa85   :  { %v2504_v62 = vpop.eup %2503 }
 0xa86   :  { %1130 = vrot.lane.b32.xlu1 %v2504_v62, %s2722_s2 }
 0xadb   :  { %v1107_v63 = vpop.permute.xlu0 %1106 }
 0xadc   :  { %v1109_v8 = vmul.f32 %v2496_v42, %v1107_v63 }
 0xade   :  { %1135 = vrot.lane.b32.xlu0 %v1109_v8, %s2723_s24 }
 0xaf8   :  { %v1131_v3 = vpop.permute.xlu1 %1130 }
 0xaf9   :  { %v1133_v5 = vmul.f32 %v2500_v47, %v1131_v3 }
 0xafb   :  { %1141 = vrot.lane.b32.xlu1 %v1133_v5, %s2723_s24 }
 0xb50   :  { %v1136_v7 = vpop.permute.xlu0 %1135 }
 0xb51   :  { %1139 = vst.msk [vmem:[#allocation11 + $0x18] sm:$0xff] %vm96_vm1, %v1136_v7  ;;  %2243 = vmatmul.mubr.msk.f32.vlgmr.msra.gmra.mrb[20].mxu0 %vm96_vm1, %v1136_v7 }
 0xb52   :  { %2392 = vmatpush3.bf16.msra.mxu0 %v2829_v10  ;;  %2264 = vmatprep.mubr.msk.f32.mxu0 %vm2721_vm0, %v2720_v1 }
 0xb53   :  { %2393 = vmatprep.subr.bf16.mxu0 %v2719_v0 }
 0xb56   :  { %2395 = vmatpush3.bf16.msra.mxu0 %v2832_v19 }
 0xb57   :  { %2402 = vmatprep.subr.bf16.mxu0 %v2719_v0 }
 0xb6d   :  { %v1142_v9 = vpop.permute.xlu1 %1141 }
 0xb6e   :  { %1145 = vst.msk [vmem:[#allocation12 + $0x20] sm:$0xff] %vm96_vm1, %v1142_v9  ;;  %2254 = vmatmul.mubr.msk.f32.vlgmr.msra.gmra.mrb[12].mxu1 %vm96_vm1, %v1142_v9 }
 0xb6f   :  { %2398 = vmatpush3.bf16.msra.mxu1 %v2836_v23  ;;  %2275 = vmatprep.mubr.msk.f32.mxu1 %vm2721_vm0, %v2720_v1 }
 0xb70   :  { %2399 = vmatprep.subr.bf16.mxu1 %v2719_v0 }
 0xb73   :  { %2401 = vmatpush3.bf16.msra.mxu1 %v2844_v27 }
 0xb74   :  { %2408 = vmatprep.subr.bf16.mxu1 %v2719_v0 }
 0xc24   :  { %v1219_v12 = vpop.f32.mrb[20].mxu0 }
 0xc25   :  { %v1223_v14 = vadd.f32 %v1219_v12, %v2895_v2  ;;  %v2244_v49 = vpop.f32.mrb[21].mxu0 }
 0xc27   :  { %2505 = vtanh.f32 %v1223_v14  ;;  %v1302_v21 = vsub.f32 0.0, %v1223_v14 }
 0xc29   :  { %v1303_v22 = vmul.f32 1.442695, %v1302_v21 }
 0xc31   :  { %v2506_v16 = vpop.eup %2505 }
 0xc32   :  { %1311 = vrot.lane.b32.xlu0 %v2506_v16, %s2722_s2 }
 0xc41   :  { %v1297_v17 = vpop.f32.mrb[12].mxu1 }
 0xc42   :  { %v1301_v18 = vadd.f32 %v1297_v17, %v2892_v61  ;;  %v2255_v20 = vpop.f32.mrb[13].mxu1 }
 0xc44   :  { %2507 = vtanh.f32 %v1301_v18  ;;  %v1326_v2 = vsub.f32 0.0, %v1301_v18 }
 0xc45   :  { %2509 = vpow2.f32 %v1303_v22 }
 0xc46   :  { %v1327_v26 = vmul.f32 1.442695, %v1326_v2 }
 0xc4e   :  { %v2508_v13 = vpop.eup %2507 }
 0xc4f   :  { %1335 = vrot.lane.b32.xlu1 %v2508_v13, %s2722_s2  ;;  %v2510_v24 = vpop.eup %2509 }
 0xc50   :  { %v1305_v25 = vadd.f32 1.0, %v2510_v24 }
 0xc52   :  { %2511 = vrcp.f32 %v1305_v25 }
 0xc53   :  { %2513 = vpow2.f32 %v1327_v26 }
 0xc5c   :  { %v2512_v28 = vpop.eup %2511 }
 0xc5d   :  { %v2514_v61 = vpop.eup %2513  ;;  %v1309_v35 = vmul.f32 %v2512_v28, %v3013_v55 }
 0xc5e   :  { %v1329_v31 = vadd.f32 1.0, %v2514_v61 }
 0xc60   :  { %2515 = vrcp.f32 %v1329_v31 }
 0xc6a   :  { %v2516_v32 = vpop.eup %2515 }
 0xc6b   :  { %v1333_v39 = vmul.f32 %v2516_v32, %v3018_v60 }
 0xca4   :  { %v1312_v29 = vpop.permute.xlu0 %1311 }
 0xca5   :  { %v1314_v30 = vmul.f32 %v2512_v28, %v1312_v29 }
 0xca7   :  { %1316 = vrot.lane.b32.xlu0 %v1314_v30, %s2723_s24 }
 0xcc1   :  { %v1336_v33 = vpop.permute.xlu1 %1335 }
 0xcc2   :  { %v1338_v34 = vmul.f32 %v2516_v32, %v1336_v33 }
 0xcc4   :  { %1340 = vrot.lane.b32.xlu1 %v1338_v34, %s2723_s24 }
 0xd19   :  { %v1317_v36 = vpop.permute.xlu0 %1316 }
 0xd1a   :  { %v3047_v37 = vadd.f32 %v1317_v36, %v1309_v35 }
 0xd1c   :  { %2517 = vtanh.f32 %v3047_v37 }
 0xd26   :  { %v2518_v38 = vpop.eup %2517 }
 0xd27   :  { %1322 = vrot.lane.b32.xlu0 %v2518_v38, %s2722_s2 }
 0xd36   :  { %v1341_v40 = vpop.permute.xlu1 %1340 }
 0xd37   :  { %v3052_v59 = vadd.f32 %v1341_v40, %v1333_v39 }
 0xd39   :  { %2519 = vtanh.f32 %v3052_v59 }
 0xd43   :  { %v2520_v41 = vpop.eup %2519 }
 0xd44   :  { %1346 = vrot.lane.b32.xlu1 %v2520_v41, %s2722_s2 }
 0xd99   :  { %v1323_v42 = vpop.permute.xlu0 %1322 }
 0xd9a   :  { %v1325_v43 = vmul.f32 %v2512_v28, %v1323_v42 }
 0xd9c   :  { %1351 = vrot.lane.b32.xlu0 %v1325_v43, %s2723_s24 }
 0xdb6   :  { %v1347_v44 = vpop.permute.xlu1 %1346 }
 0xdb7   :  { %v1349_v4 = vmul.f32 %v2516_v32, %v1347_v44 }
 0xdb9   :  { %1357 = vrot.lane.b32.xlu1 %v1349_v4, %s2723_s24 }
 0xe0e   :  { %v1352_v45 = vpop.permute.xlu0 %1351 }
 0xe0f   :  { %1355 = vst.msk [vmem:[#allocation11 + $0x20] sm:$0xff] %vm96_vm1, %v1352_v45  ;;  %2265 = vmatmul.mubr.msk.f32.vlgmr.msra.gmra.mrb[22].mxu0 %vm96_vm1, %v1352_v45 }
 0xe10   :  { %2404 = vmatpush3.bf16.msra.mxu0 %v2829_v10  ;;  %2286 = vmatprep.mubr.msk.f32.mxu0 %vm2721_vm0, %v2720_v1 }
 0xe11   :  { %2405 = vmatprep.subr.bf16.mxu0 %v2719_v0 }
 0xe14   :  { %2407 = vmatpush3.bf16.msra.mxu0 %v2832_v19 }
 0xe15   :  { %2414 = vmatprep.subr.bf16.mxu0 %v2719_v0 }
 0xe2b   :  { %v1358_v47 = vpop.permute.xlu1 %1357 }
 0xe2c   :  { %1361 = vst.msk [vmem:[#allocation12 + $0x18] sm:$0xff] %vm96_vm1, %v1358_v47  ;;  %2276 = vmatmul.mubr.msk.f32.vlgmr.msra.gmra.mrb[14].mxu1 %vm96_vm1, %v1358_v47 }
 0xe2d   :  { %2410 = vmatpush3.bf16.msra.mxu1 %v2836_v23  ;;  %2297 = vmatprep.mubr.msk.f32.mxu1 %vm2721_vm0, %v2720_v1 }
 0xe2e   :  { %2411 = vmatprep.subr.bf16.mxu1 %v2719_v0 }
 0xe31   :  { %2413 = vmatpush3.bf16.msra.mxu1 %v2844_v27 }
 0xe32   :  { %2420 = vmatprep.subr.bf16.mxu1 %v2719_v0 }
 0xee2   :  { %v1435_v10 = vpop.f32.mrb[22].mxu0 }
 0xee3   :  { %v1439_v19 = vadd.f32 %v1435_v10, %v2899_v6  ;;  %v2266_v48 = vpop.f32.mrb[23].mxu0 }
 0xee5   :  { %2521 = vtanh.f32 %v1439_v19  ;;  %v1518_v56 = vsub.f32 0.0, %v1439_v19 }
 0xee7   :  { %v1519_v27 = vmul.f32 1.442695, %v1518_v56  ;;  %v1798_v56 = vld [vmem:[#allocation8 + $0x18] sm:$0xff] }
 0xeef   :  { %v2522_v50 = vpop.eup %2521 }
 0xef0   :  { %1527 = vrot.lane.b32.xlu0 %v2522_v50, %s2722_s2 }
 0xeff   :  { %v1513_v52 = vpop.f32.mrb[14].mxu1 }
 0xf00   :  { %v1517_v23 = vadd.f32 %v1513_v52, %v2888_v57  ;;  %v2277_v53 = vpop.f32.mrb[15].mxu1  ;;  %v1795_v52 = vld [vmem:[#allocation8] sm:$0xff] }
 0xf01   :  { %v1797_v53 = vld [vmem:[#allocation8 + $0x10] sm:$0xff] }
 0xf02   :  { %2523 = vtanh.f32 %v1517_v23  ;;  %v1542_v6 = vsub.f32 0.0, %v1517_v23  ;;  %v1796_v23 = vld [vmem:[#allocation8 + $0x8] sm:$0xff] }
 0xf03   :  { %2525 = vpow2.f32 %v1519_v27  ;;  %v2418_v27 = vpack.c.bf16 %v1798_v56, %v1797_v53 }
 0xf04   :  { %v1543_v60 = vmul.f32 1.442695, %v1542_v6  ;;  %v1874_v6 = vld [vmem:[#allocation9 + $0x8] sm:$0xff] }
 0xf0c   :  { %v2524_v55 = vpop.eup %2523 }
 0xf0d   :  { %1551 = vrot.lane.b32.xlu1 %v2524_v55, %s2722_s2  ;;  %v2526_v54 = vpop.eup %2525  ;;  %v2415_v55 = vpack.c.bf16 %v1796_v23, %v1795_v52 }
 0xf0e   :  { %v1521_v58 = vadd.f32 1.0, %v2526_v54 }
 0xf10   :  { %2527 = vrcp.f32 %v1521_v58  ;;  %v1873_v58 = vld [vmem:[#allocation9] sm:$0xff] }
 0xf11   :  { %2529 = vpow2.f32 %v1543_v60  ;;  %v1875_v60 = vld [vmem:[#allocation9 + $0x10] sm:$0xff] }
 0xf1a   :  { %v2528_v62 = vpop.eup %2527 }
 0xf1b   :  { %v2530_v57 = vpop.eup %2529  ;;  %v1525_v12 = vmul.f32 %v2528_v62, %v3047_v37 }
 0xf1c   :  { %v1545_v3 = vadd.f32 1.0, %v2530_v57 }
 0xf1e   :  { %2531 = vrcp.f32 %v1545_v3 }
 0xf28   :  { %v2532_v5 = vpop.eup %2531 }
 0xf29   :  { %v1549_v17 = vmul.f32 %v2532_v5, %v3052_v59 }
 0xf62   :  { %v1528_v63 = vpop.permute.xlu0 %1527 }
 0xf63   :  { %v1530_v8 = vmul.f32 %v2528_v62, %v1528_v63  ;;  %v1876_v63 = vld [vmem:[#allocation9 + $0x18] sm:$0xff] }
 0xf65   :  { %1532 = vrot.lane.b32.xlu0 %v1530_v8, %s2723_s24  ;;  %v2424_v8 = vpack.c.bf16 %v1876_v63, %v1875_v60 }
 0xf7f   :  { %v1552_v7 = vpop.permute.xlu1 %1551 }
 0xf80   :  { %v1554_v9 = vmul.f32 %v2532_v5, %v1552_v7 }
 0xf82   :  { %1556 = vrot.lane.b32.xlu1 %v1554_v9, %s2723_s24 }
 0xfd7   :  { %v1533_v14 = vpop.permute.xlu0 %1532 }
 0xfd8   :  { %v1535_v49 = vadd.f32 %v1533_v14, %v1525_v12 }
 0xfda   :  { %2533 = vtanh.f32 %v1535_v49 }
 0xfe4   :  { %v2534_v16 = vpop.eup %2533 }
 0xfe5   :  { %1538 = vrot.lane.b32.xlu0 %v2534_v16, %s2722_s2 }
 0xff4   :  { %v1557_v18 = vpop.permute.xlu1 %1556 }
 0xff5   :  { %v1559_v20 = vadd.f32 %v1557_v18, %v1549_v17 }
 0xff7   :  { %2535 = vtanh.f32 %v1559_v20 }
0x1001   :  { %v2536_v13 = vpop.eup %2535 }
0x1002   :  { %1562 = vrot.lane.b32.xlu1 %v2536_v13, %s2722_s2 }
0x1057   :  { %v1539_v21 = vpop.permute.xlu0 %1538 }
0x1058   :  { %v1541_v22 = vmul.f32 %v2528_v62, %v1539_v21  ;;  %v2421_v62 = vpack.c.bf16 %v1874_v6, %v1873_v58 }
0x105a   :  { %1567 = vrot.lane.b32.xlu0 %v1541_v22, %s2723_s24 }
0x1074   :  { %v1563_v24 = vpop.permute.xlu1 %1562 }
0x1075   :  { %v1565_v25 = vmul.f32 %v2532_v5, %v1563_v24 }
0x1077   :  { %1573 = vrot.lane.b32.xlu1 %v1565_v25, %s2723_s24 }
0x10cc   :  { %v1568_v2 = vpop.permute.xlu0 %1567 }
0x10cd   :  { %1571 = vst.msk [vmem:[#allocation11 + $0x28] sm:$0xff] %vm96_vm1, %v1568_v2  ;;  %2287 = vmatmul.mubr.msk.f32.vlgmr.msra.gmra.mrb[24].mxu0 %vm96_vm1, %v1568_v2 }
0x10ce   :  { %2308 = vmatprep.mubr.msk.f32.mxu0 %vm2721_vm0, %v2720_v1  ;;  %2416 = vmatpush3.bf16.msra.mxu0 %v2415_v55 }
0x10cf   :  { %2417 = vmatprep.subr.bf16.mxu0 %v2719_v0 }
0x10d2   :  { %2419 = vmatpush3.bf16.msra.mxu0 %v2418_v27 }
0x10e9   :  { %v1574_v26 = vpop.permute.xlu1 %1573 }
0x10ea   :  { %1577 = vst.msk [vmem:[#allocation12 + $0x10] sm:$0xff] %vm96_vm1, %v1574_v26  ;;  %2298 = vmatmul.mubr.msk.f32.vlgmr.msra.gmra.mrb[16].mxu1 %vm96_vm1, %v1574_v26 }
0x10eb   :  { %2319 = vmatprep.mubr.msk.f32.mxu1 %vm2721_vm0, %v2720_v1  ;;  %2422 = vmatpush3.bf16.msra.mxu1 %v2421_v62 }
0x10ec   :  { %2423 = vmatprep.subr.bf16.mxu1 %v2719_v0 }
0x10ef   :  { %2425 = vmatpush3.bf16.msra.mxu1 %v2424_v8 }
0x11a0   :  { %v1651_v28 = vpop.f32.mrb[24].mxu0 }
0x11a1   :  { %v1655_v29 = vadd.f32 %v1651_v28, %v2903_v11  ;;  %v2288_v30 = vpop.f32.mrb[25].mxu0 }
0x11a3   :  { %2537 = vtanh.f32 %v1655_v29  ;;  %v1734_v35 = vsub.f32 0.0, %v1655_v29 }
0x11a5   :  { %v1735_v36 = vmul.f32 1.442695, %v1734_v35 }
0x11ad   :  { %v2538_v61 = vpop.eup %2537 }
0x11ae   :  { %1743 = vrot.lane.b32.xlu0 %v2538_v61, %s2722_s2 }
0x11bd   :  { %v1729_v31 = vpop.f32.mrb[16].mxu1 }
0x11be   :  { %v1733_v32 = vadd.f32 %v1729_v31, %v2884_v51  ;;  %v2299_v33 = vpop.f32.mrb[17].mxu1 }
0x11c0   :  { %2539 = vtanh.f32 %v1733_v32  ;;  %v1758_v11 = vsub.f32 0.0, %v1733_v32 }
0x11c1   :  { %2541 = vpow2.f32 %v1735_v36 }
0x11c2   :  { %v1759_v38 = vmul.f32 1.442695, %v1758_v11 }
0x11ca   :  { %v2540_v34 = vpop.eup %2539 }
0x11cb   :  { %1767 = vrot.lane.b32.xlu1 %v2540_v34, %s2722_s2  ;;  %v2542_v1 = vpop.eup %2541 }
0x11cc   :  { %v1737_v37 = vadd.f32 1.0, %v2542_v1 }
0x11ce   :  { %2543 = vrcp.f32 %v1737_v37 }
0x11cf   :  { %2545 = vpow2.f32 %v1759_v38 }
0x11d8   :  { %v2544_v39 = vpop.eup %2543 }
0x11d9   :  { %v2546_v51 = vpop.eup %2545  ;;  %v1741_v4 = vmul.f32 %v2544_v39, %v1535_v49 }
0x11da   :  { %v1761_v41 = vadd.f32 1.0, %v2546_v51 }
0x11dc   :  { %2547 = vrcp.f32 %v1761_v41 }
0x11e6   :  { %v2548_v42 = vpop.eup %2547 }
0x11e7   :  { %v1765_v19 = vmul.f32 %v2548_v42, %v1559_v20 }
0x1220   :  { %v1744_v40 = vpop.permute.xlu0 %1743 }
0x1221   :  { %v1746_v59 = vmul.f32 %v2544_v39, %v1744_v40 }
0x1223   :  { %1748 = vrot.lane.b32.xlu0 %v1746_v59, %s2723_s24 }
0x123d   :  { %v1768_v43 = vpop.permute.xlu1 %1767 }
0x123e   :  { %v1770_v44 = vmul.f32 %v2548_v42, %v1768_v43 }
0x1240   :  { %1772 = vrot.lane.b32.xlu1 %v1770_v44, %s2723_s24 }
0x1295   :  { %v1749_v45 = vpop.permute.xlu0 %1748 }
0x1296   :  { %v3100_v47 = vadd.f32 %v1749_v45, %v1741_v4 }
0x1298   :  { %2549 = vtanh.f32 %v3100_v47 }
0x12a2   :  { %v2550_v10 = vpop.eup %2549 }
0x12a3   :  { %1754 = vrot.lane.b32.xlu0 %v2550_v10, %s2722_s2 }
0x12b2   :  { %v1773_v48 = vpop.permute.xlu1 %1772 }
0x12b3   :  { %v3104_v50 = vadd.f32 %v1773_v48, %v1765_v19 }
0x12b5   :  { %2551 = vtanh.f32 %v3104_v50 }
0x12bf   :  { %v2552_v54 = vpop.eup %2551 }
0x12c0   :  { %1778 = vrot.lane.b32.xlu1 %v2552_v54, %s2722_s2 }
0x1315   :  { %v1755_v57 = vpop.permute.xlu0 %1754 }
0x1316   :  { %v1757_v3 = vmul.f32 %v2544_v39, %v1755_v57 }
0x1318   :  { %1783 = vrot.lane.b32.xlu0 %v1757_v3, %s2723_s24 }
0x1332   :  { %v1779_v5 = vpop.permute.xlu1 %1778 }
0x1333   :  { %v1781_v7 = vmul.f32 %v2548_v42, %v1779_v5 }
0x1335   :  { %1789 = vrot.lane.b32.xlu1 %v1781_v7, %s2723_s24 }
0x138a   :  { %v1784_v9 = vpop.permute.xlu0 %1783 }
0x138b   :  { %1787 = vst.msk [vmem:[#allocation11 + $0x30] sm:$0xff] %vm96_vm1, %v1784_v9  ;;  %2309 = vmatmul.mubr.msk.f32.vlgmr.msra.gmra.mrb[26].mxu0 %vm96_vm1, %v1784_v9 }
0x13a7   :  { %v1790_v12 = vpop.permute.xlu1 %1789 }
0x13a8   :  { %1793 = vst.msk [vmem:[#allocation12 + $0x8] sm:$0xff] %vm96_vm1, %v1790_v12  ;;  %2320 = vmatmul.mubr.msk.f32.vlgmr.msra.gmra.mrb[18].mxu1 %vm96_vm1, %v1790_v12 }
0x145e   :  { %v1867_v0 = vpop.f32.mrb[26].mxu0 }
0x145f   :  { %v1871_v14 = vadd.f32 %v1867_v0, %v2907_v15  ;;  %v2310_v49 = vpop.f32.mrb[27].mxu0 }
0x1461   :  { %2553 = vtanh.f32 %v1871_v14  ;;  %v1950_v21 = vsub.f32 0.0, %v1871_v14 }
0x1463   :  { %v1951_v22 = vmul.f32 1.442695, %v1950_v21 }
0x146b   :  { %v2554_v16 = vpop.eup %2553 }
0x146c   :  { %1959 = vrot.lane.b32.xlu0 %v2554_v16, %s2722_s2 }
0x147b   :  { %v1945_v17 = vpop.f32.mrb[18].mxu1 }
0x147c   :  { %v1949_v18 = vadd.f32 %v1945_v17, %v2880_v46  ;;  %v2321_v20 = vpop.f32.mrb[19].mxu1 }
0x147e   :  { %2555 = vtanh.f32 %v1949_v18  ;;  %v1974_v15 = vsub.f32 0.0, %v1949_v18 }
0x147f   :  { %2557 = vpow2.f32 %v1951_v22 }
0x1480   :  { %v1975_v2 = vmul.f32 1.442695, %v1974_v15 }
0x1488   :  { %v2556_v13 = vpop.eup %2555 }
0x1489   :  { %1983 = vrot.lane.b32.xlu1 %v2556_v13, %s2722_s2  ;;  %v2558_v24 = vpop.eup %2557 }
0x148a   :  { %v1953_v25 = vadd.f32 1.0, %v2558_v24 }
0x148c   :  { %2559 = vrcp.f32 %v1953_v25 }
0x148d   :  { %2561 = vpow2.f32 %v1975_v2 }
0x1496   :  { %v2560_v26 = vpop.eup %2559 }
0x1497   :  { %v2562_v46 = vpop.eup %2561  ;;  %v1957_v33 = vmul.f32 %v2560_v26, %v3100_v47 }
0x1498   :  { %v1977_v30 = vadd.f32 1.0, %v2562_v46 }
0x149a   :  { %2563 = vrcp.f32 %v1977_v30 }
0x14a4   :  { %v2564_v61 = vpop.eup %2563 }
0x14a5   :  { %v1981_v1 = vmul.f32 %v2564_v61, %v3104_v50 }
0x14de   :  { %v1960_v28 = vpop.permute.xlu0 %1959 }
0x14df   :  { %v1962_v29 = vmul.f32 %v2560_v26, %v1960_v28 }
0x14e1   :  { %1964 = vrot.lane.b32.xlu0 %v1962_v29, %s2723_s24 }
0x14fb   :  { %v1984_v31 = vpop.permute.xlu1 %1983 }
0x14fc   :  { %v1986_v32 = vmul.f32 %v2564_v61, %v1984_v31 }
0x14fe   :  { %1988 = vrot.lane.b32.xlu1 %v1986_v32, %s2723_s24 }
0x1553   :  { %v1965_v34 = vpop.permute.xlu0 %1964 }
0x1554   :  { %v1967_v35 = vadd.f32 %v1965_v34, %v1957_v33 }
0x1556   :  { %2565 = vtanh.f32 %v1967_v35 }
0x1560   :  { %v2566_v36 = vpop.eup %2565 }
0x1561   :  { %1970 = vrot.lane.b32.xlu0 %v2566_v36, %s2722_s2 }
0x1570   :  { %v1989_v37 = vpop.permute.xlu1 %1988 }
0x1571   :  { %v1991_v11 = vadd.f32 %v1989_v37, %v1981_v1 }
0x1573   :  { %2567 = vtanh.f32 %v1991_v11 }
0x157d   :  { %v2568_v38 = vpop.eup %2567 }
0x157e   :  { %1994 = vrot.lane.b32.xlu1 %v2568_v38, %s2722_s2 }
0x15d3   :  { %v1971_v39 = vpop.permute.xlu0 %1970 }
0x15d4   :  { %v1973_v40 = vmul.f32 %v2560_v26, %v1971_v39 }
0x15d6   :  { %1999 = vrot.lane.b32.xlu0 %v1973_v40, %s2723_s24 }
0x15f0   :  { %v1995_v59 = vpop.permute.xlu1 %1994 }
0x15f1   :  { %v1997_v51 = vmul.f32 %v2564_v61, %v1995_v59 }
0x15f3   :  { %2005 = vrot.lane.b32.xlu1 %v1997_v51, %s2723_s24 }
0x1648   :  { %v2000_v41 = vpop.permute.xlu0 %1999 }
0x1649   :  { %2003 = vst.msk [vmem:[#allocation11 + $0x38] sm:$0xff] %vm96_vm1, %v2000_v41 }
0x164a   :  { %2668 = shalt.err (!%p2665_p8)
}
0x164b   :  { %s2669_s30 = scalar_lea.hbm %s3165_s5, 1024 }
0x164c   :  { %p2670_p9 = scmp.ne.s32.totalorder %s3165_s5, %s2669_s30  ;;  %p2673_p10 = scmp.lt.u32.totalorder %s2669_s30, %s3165_s5 }
0x164e   :  { %p2675_p11 = pnand %p2673_p10, %p2670_p9 }
0x1650   :  { %2678 = shalt.err (!%p2675_p11)
}
0x1651   :  { %2020 = dma.vmem_to_hbm [thread:$0]  %s2015_s26, 1024, %s3165_s5, [#allocation5], %s2715_s1, %s2715_s1, %s2716_s21  }
0x1652   :  { %s2725_s12 = smov [#allocation12]  }
0x1653   :  { %s2026_s13 = sshll.u32 %s2725_s12, 4  ;;  %s2027_s13 = int_to_ptr.vmem [resolvable:$true] %s2026_s13 }
0x1654   :  { %s2679_s14 = scalar_lea.vmem %s2027_s13, 1024  ;;  %p2684_p13 = scmp.lt.s32.totalorder %s2027_s13, %s2027_s13 }
0x1655   :  { %p2680_p12 = scmp.ne.s32.totalorder %s2027_s13, %s2679_s14  ;;  %p2685_p0 = scmp.lt.s32.totalorder %s2679_s14, %s2679_s14 }
0x1657   :  { %p2686_p1 = por %p2685_p0, %p2684_p13 }
0x1659   :  { %p2687_p2 = pnand %p2686_p1, %p2680_p12 }
0x1665   :  { %v2006_v42 = vpop.permute.xlu1 %2005 }
0x1666   :  { %2008 = vst.msk [vmem:[#allocation12] sm:$0xff] %vm96_vm1, %v2006_v42 }
0x1667   :  { %2690 = shalt.err (!%p2687_p2)
}
0x1668   :  { %s2691_s17 = scalar_lea.hbm %s3166_s6, 1024 }
0x1669   :  { %p2692_p3 = scmp.ne.s32.totalorder %s3166_s6, %s2691_s17  ;;  %p2695_p4 = scmp.lt.u32.totalorder %s2691_s17, %s3166_s6 }
0x166b   :  { %p2697_p5 = pnand %p2695_p4, %p2692_p3 }
0x166d   :  { %2700 = shalt.err (!%p2697_p5)
}
0x166e   :  { %2032 = dma.vmem_to_hbm [thread:$0]  %s2027_s13, 1024, %s3166_s6, [#allocation13], %s2715_s1, %s2715_s1, %s2716_s21  }
0x166f   :  { %2707 = dma.done.wait [#allocation5], 1024  }
0x1670   :  { %2708 = vsyncadd [#allocation5], 4294966272 }
0x1671   :  { %2709 = dma.done.wait [#allocation13], 1024  }
0x1672   :  { %2710 = vsyncadd [#allocation13], 4294966272 }
0x1673   :  { %2039 = vsyncpa [#allocation4], 1 }
0x1674   :  { %2040 = vsyncpa [#allocation7], 1 }
0x1675   :  { %2041 = vsyncpa [#allocation10], 1 }
0x1676   :  { %2042 = vsyncpa [#allocation5], 1 }
0x1677   :  { %2043 = vsyncpa [#allocation13], 1 }

</bundles_post_ra>
